<compile_context>
chip_gen: v7x
topology: tpu7x:2x2x1
jax: 0.10.0
libtpu: 0.0.40
codegen_flags: <defaults>
</compile_context>

<pallas_src>
import functools

import jax
import jax.numpy as jnp
import numpy as np
from jax.experimental import pallas as pl
from jax.experimental.pallas import tpu as pltpu


def _round_up(x, m):
    return (x + m - 1) // m * m


def _pick_tiling(D, n_split, max_tk=8192):
    """Pick the K-tile size. Prefer the largest tk <= max_tk that divides D, is a multiple
    of 128, and gives a K-step count divisible by n_split (no K padding). Fallback pads D."""
    cap = min(max_tk, max(128, D // max(n_split, 1)))
    cap = cap // 128 * 128
    for t in range(cap, 127, -128):
        if D % t == 0 and (D // t) % n_split == 0:
            return t, D
    t = max(cap, 128)
    return t, _round_up(D, t * n_split)


# --------------------------------------------------------------------------------------
# Stage 1: K-streamed Linear(D, 512), split across n_split cores (v7x dual-TC)
# --------------------------------------------------------------------------------------
def _stream_matmul_kernel(x_ref, w1_ref, partial_ref, acc_ref):
    k = pl.program_id(1)

    @pl.when(k == 0)
    def _init():
        acc_ref[...] = jnp.zeros_like(acc_ref)

    # bf16 x / bf16 (BN-folded) w1, f32 accumulation on the MXU.
    acc_ref[...] += jnp.dot(x_ref[...], w1_ref[...],
                            preferred_element_type=jnp.float32)

    @pl.when(k == pl.num_programs(1) - 1)
    def _store():
        partial_ref[...] = acc_ref[...]


# --------------------------------------------------------------------------------------
# One-time parameter preparation (BN fold, bf16 cast, lane padding, tk selection)
# --------------------------------------------------------------------------------------
def prepare_params(params, input_size, *, n_split=2, max_tk=8192):
    """Fold eval-mode BatchNorm into Linear #1, cast weights to bf16, pad lane dims to 128,
    and pick a divisor-aligned K-tile size. Returns (prep_dict, tk)."""
    C = params["bn_gamma"].shape[0]
    S = input_size // 16
    HW = S * S
    D = C * HW
    eps = 1e-5

    inv_std = 1.0 / jnp.sqrt(params["bn_var"] + eps)
    scale_c = params["bn_gamma"] * inv_std                      # (C,)
    shift_c = params["bn_beta"] - params["bn_mean"] * scale_c   # (C,)
    # per-channel -> per flattened feature (NCHW flatten: C slowest, then H, W)
    scale_d = jnp.repeat(scale_c, HW)                           # (D,)
    shift_d = jnp.repeat(shift_c, HW)                           # (D,)

    w1 = params["w1"]                                           # (D, 512) f32
    b1 = params["b1"] + shift_d @ w1                            # (512,)  BN shift folded
    w1 = scale_d[:, None] * w1                                  # BN scale folded

    hidden = w1.shape[1]                                        # 512
    out_neurons = params["w2"].shape[1]                         # 101
    age_group = params["w3"].shape[1]

    tk, D_pad = _pick_tiling(D, n_split, max_tk)
    O_pad = _round_up(out_neurons, 128)                         # 101 -> 128
    G_pad = _round_up(age_group, 128)

    if D_pad == D:
        w1_p = w1.astype(jnp.bfloat16)
    else:  # rare fallback path; zero rows contribute nothing
        w1_p = jnp.zeros((D_pad, hidden), jnp.float32).at[:D].set(w1).astype(jnp.bfloat16)

    w2_p = (jnp.zeros((hidden, O_pad), jnp.float32)
            .at[:, :out_neurons].set(params["w2"]).astype(jnp.bfloat16))
    b2_p = jnp.zeros((1, O_pad), jnp.float32).at[0, :out_neurons].set(params["b2"])
    w3_p = (jnp.zeros((O_pad, G_pad), jnp.float32)
            .at[:out_neurons, :age_group].set(params["w3"]).astype(jnp.bfloat16))
    b3_p = jnp.zeros((1, G_pad), jnp.float32).at[0, :age_group].set(params["b3"])

    prep = {
        "w1": w1_p,                                             # (D_pad, 512) bf16 — streamed
        "b1": b1.reshape(1, hidden).astype(jnp.float32),        # (1, 512)   f32
        "w2": w2_p, "b2": b2_p,                                 # (512, 128) bf16, (1, 128) f32
        "w3": w3_p, "b3": b3_p,                                 # (128, G_pad) bf16, (1, G_pad) f32
    }
    return prep, tk


# --------------------------------------------------------------------------------------
# Forward
# --------------------------------------------------------------------------------------
@functools.partial(jax.jit,
                   static_argnames=("tk", "n_split", "out_neurons", "age_group"))
def age_estimation_forward(x_nchw, prep, *, tk, n_split, out_neurons, age_group):
    """x_nchw: (N, 512, S, S) f32. Returns (x_age (N, 101), x_group (N, age_group))."""
    N, C, H, W = x_nchw.shape
    D = C * H * W
    D_pad, hidden = prep["w1"].shape
    O_pad = prep["w2"].shape[1]
    G_pad = prep["w3"].shape[1]

    n_k = D_pad // tk
    assert D_pad % tk == 0 and n_k % n_split == 0
    nkps = n_k // n_split                                        # K steps per split/core

    # bf16 sublane-aligned batch pad only (row-only pad when tk | D, which is the normal case).
    N_pad = _round_up(max(N, 16), 16)
    x = x_nchw.reshape(N, D).astype(jnp.bfloat16)                # nn.Flatten on NCHW layout
    x = jnp.pad(x, ((0, N_pad - N), (0, D_pad - D)))

    w1_bytes = D_pad * hidden * 2
    x_bytes = N_pad * D_pad * 2
    partial_bytes = n_split * N_pad * hidden * 4

    # --- Stage 1: streamed K-tiled matmul, split across n_split cores ------------------
    partials = pl.pallas_call(
        _stream_matmul_kernel,
        out_shape=jax.ShapeDtypeStruct((n_split * N_pad, hidden), jnp.float32),
        grid_spec=pltpu.PrefetchScalarGridSpec(
            num_scalar_prefetch=0,
            grid=(n_split, nkps),
            in_specs=[
                pl.BlockSpec((N_pad, tk), lambda c, k: (0, c * nkps + k)),   # x stream
                pl.BlockSpec((tk, hidden), lambda c, k: (c * nkps + k, 0)),  # w1 stream (bf16)
            ],
            out_specs=pl.BlockSpec((N_pad, hidden), lambda c, k: (c, 0)),    # per-core partial
            scratch_shapes=[pltpu.VMEM((N_pad, hidden), jnp.float32)],       # f32 accumulator
        ),
        compiler_params=pltpu.CompilerParams(
            dimension_semantics=("parallel", "arbitrary"),   # split axis / K reduction
            vmem_limit_bytes=48 * 1024 * 1024,               # <=~18 MiB used; v7x-safe (<64 MiB)
        ),
        cost_estimate=pl.CostEstimate(
            flops=2 * N_pad * D_pad * hidden,
            transcendentals=0,
            bytes_accessed=w1_bytes + x_bytes + partial_bytes,
        ),
    )(x, prep["w1"])

    # --- Stage 2: tiny fused epilogue (combine partials + bias + ReLU + two matmuls) ---
    def _epilogue_kernel(p_ref, b1_ref, w2_ref, b2_ref, w3_ref, b3_ref,
                         age_ref, group_ref):
        h = p_ref[0:N_pad, :]
        for i in range(1, n_split):                              # static, tiny
            h = h + p_ref[i * N_pad:(i + 1) * N_pad, :]
        h = jnp.maximum(h + b1_ref[...], 0.0).astype(jnp.bfloat16)   # dist=False -> ReLU
        age = jnp.dot(h, w2_ref[...],
                      preferred_element_type=jnp.float32) + b2_ref[...]
        group = jnp.dot(age.astype(jnp.bfloat16), w3_ref[...],
                        preferred_element_type=jnp.float32) + b3_ref[...]
        age_ref[...] = age
        group_ref[...] = group

    age_p, group_p = pl.pallas_call(
        _epilogue_kernel,
        out_shape=(
            jax.ShapeDtypeStruct((N_pad, O_pad), jnp.float32),
            jax.ShapeDtypeStruct((N_pad, G_pad), jnp.float32),
        ),
    )(partials, prep["b1"], prep["w2"], prep["b2"], prep["w3"], prep["b3"])

    return age_p[:N, :out_neurons], group_p[:N, :age_group]


# --------------------------------------------------------------------------------------
# Synthetic parameters + pure-JAX reference
# --------------------------------------------------------------------------------------
def init_params(key, input_size, age_group):
    C = 512
    S = input_size // 16
    D = C * S * S
    out_neurons = 101
    ks = jax.random.split(key, 10)
    return {
        # BatchNorm2d(512) — deterministic synthetic stats/affine
        "bn_gamma": 1.0 + 0.1 * jax.random.normal(ks[0], (C,), jnp.float32),
        "bn_beta": 0.1 * jax.random.normal(ks[1], (C,), jnp.float32),
        "bn_mean": 0.1 * jax.random.normal(ks[2], (C,), jnp.float32),
        "bn_var": 0.5 + jnp.abs(jax.random.normal(ks[3], (C,), jnp.float32)),
        # Linear(D, 512)  (stored as (in, out) so kernel does x @ W)
        "w1": jax.random.normal(ks[4], (D, 512), jnp.float32) / np.sqrt(D),
        "b1": 0.01 * jax.random.normal(ks[5], (512,), jnp.float32),
        # Linear(512, 101)
        "w2": jax.random.normal(ks[6], (512, out_neurons), jnp.float32) / np.sqrt(512.0),
        "b2": 0.01 * jax.random.normal(ks[7], (out_neurons,), jnp.float32),
        # Linear(101, age_group)
        "w3": jax.random.normal(ks[8], (out_neurons, age_group), jnp.float32) / np.sqrt(101.0),
        "b3": 0.01 * jax.random.normal(ks[9], (age_group,), jnp.float32),
    }


def reference_forward(x_nchw, params):
    """Pure-JAX f32 reference of the PyTorch forward (eval-mode BN, dist=False -> ReLU)."""
    eps = 1e-5
    xn = (x_nchw - params["bn_mean"][None, :, None, None]) / jnp.sqrt(
        params["bn_var"][None, :, None, None] + eps)
    xn = xn * params["bn_gamma"][None, :, None, None] + params["bn_beta"][None, :, None, None]
    xf = xn.reshape(x_nchw.shape[0], -1)
    h = jnp.maximum(xf @ params["w1"] + params["b1"], 0.0)
    age = h @ params["w2"] + params["b2"]
    group = age @ params["w3"] + params["b3"]
    return age, group


if __name__ == "__main__":
    # Small, shape-consistent config: input_size=32 -> spatial 2x2, D = 512*4 = 2048.
    # _pick_tiling chooses tk=1024 -> grid=(2, 1): exercises both the split axis and the
    # accumulator/finalize path. (For the real input_size=112, D=25088 -> tk=6272, grid=(2,2).)
    input_size = 32
    age_group = 8
    batch = 2
    n_split = 2          # dual-TensorCore K split on v7x; harmless outer loop on v5e/v6e

    key = jax.random.PRNGKey(0)
    kx, kp = jax.random.split(key)
    S = input_size // 16
    x = jax.random.normal(kx, (batch, 512, S, S), jnp.float32)
    params = init_params(kp, input_size, age_group)

    prep, tk = prepare_params(params, input_size, n_split=n_split)  # one-time transform
    age, group = jax.block_until_ready(
        age_estimation_forward(x, prep, tk=tk, n_split=n_split,
                               out_neurons=101, age_group=age_group))

    ref_age, ref_group = reference_forward(x, params)
    # bf16 weight/activation streams with f32 accumulation: loosened tolerance vs f32 reference.
    np.testing.assert_allclose(np.asarray(age), np.asarray(ref_age), rtol=3e-2, atol=3e-2)
    np.testing.assert_allclose(np.asarray(group), np.asarray(ref_group), rtol=3e-2, atol=3e-2)
    assert age.shape == (batch, 101) and group.shape == (batch, age_group)

    print("KERNEL_OK")
</pallas_src>

<mosaic_0001>
module attributes {stable_mosaic.version = 11 : i64} {
  func.func @_stream_matmul_kernel(%arg0: i32, %arg1: i32, %arg2: memref<16x1024xbf16, #tpu.memory_space<vmem>>, %arg3: memref<1024x512xbf16, #tpu.memory_space<vmem>>, %arg4: memref<16x512xf32, #tpu.memory_space<vmem>>, %arg5: memref<16x512xf32, #tpu.memory_space<vmem>>) attributes {dimension_semantics = [#tpu.dimension_semantics<parallel>, #tpu.dimension_semantics<arbitrary>], iteration_bounds = array<i64: 2, 1>, scalar_prefetch = 0 : i64, scratch_operands = 1 : i64, tpu.core_type = #tpu.core_type<tc>, window_params = [{transform_indices = @transform_0, window_bounds = array<i64: 16, 1024>}, {transform_indices = @transform_1, window_bounds = array<i64: 1024, 512>}, {transform_indices = @transform_2, window_bounds = array<i64: 16, 512>}]} {
    %c0_i32 = arith.constant 0 : i32
    %0 = arith.cmpi eq, %arg1, %c0_i32 : i32
    %1 = arith.extui %0 : i1 to i32
    %c0_i32_0 = arith.constant 0 : i32
    %2 = arith.cmpi ne, %1, %c0_i32_0 : i32
    scf.if %2 {
      %cst_10 = arith.constant 0.000000e+00 : f32
      %12 = vector.broadcast %cst_10 : f32 to vector<16x512xf32>
      %c0_11 = arith.constant 0 : index
      %c0_12 = arith.constant 0 : index
      %13 = vector.load %arg5[%c0_11, %c0_12] : memref<16x512xf32, #tpu.memory_space<vmem>>, vector<16x512xf32>
      tpu.vector_store %arg5[%c0_11, %c0_12], %12 {strides = array<i32>} : memref<16x512xf32, #tpu.memory_space<vmem>>, vector<16x512xf32>,
    } else {
    }
    %c0 = arith.constant 0 : index
    %c0_1 = arith.constant 0 : index
    %3 = vector.load %arg5[%c0, %c0_1] : memref<16x512xf32, #tpu.memory_space<vmem>>, vector<16x512xf32>
    %c0_2 = arith.constant 0 : index
    %c0_3 = arith.constant 0 : index
    %4 = vector.load %arg2[%c0_2, %c0_3] : memref<16x1024xbf16, #tpu.memory_space<vmem>>, vector<16x1024xbf16>
    %c0_4 = arith.constant 0 : index
    %c0_5 = arith.constant 0 : index
    %5 = vector.load %arg3[%c0_4, %c0_5] : memref<1024x512xbf16, #tpu.memory_space<vmem>>, vector<1024x512xbf16>
    %cst = arith.constant dense<0.000000e+00> : vector<16x512xf32>
    %6 = tpu.matmul %4, %5, %cst {dimension_numbers = #tpu.dot_dimension_numbers<[1], [0], [0], [1], [0, 0, 1, 1], [], []>} : vector<16x1024xbf16>, vector<1024x512xbf16>, vector<16x512xf32> -> vector<16x512xf32>
    %7 = arith.addf %3, %6 : vector<16x512xf32>
    %c0_6 = arith.constant 0 : index
    %c0_7 = arith.constant 0 : index
    %8 = vector.load %arg5[%c0_6, %c0_7] : memref<16x512xf32, #tpu.memory_space<vmem>>, vector<16x512xf32>
    tpu.vector_store %arg5[%c0_6, %c0_7], %7 {strides = array<i32>} : memref<16x512xf32, #tpu.memory_space<vmem>>, vector<16x512xf32>,
    %c0_i32_8 = arith.constant 0 : i32
    %9 = arith.cmpi eq, %arg1, %c0_i32_8 : i32
    %10 = arith.extui %9 : i1 to i32
    %c0_i32_9 = arith.constant 0 : i32
    %11 = arith.cmpi ne, %10, %c0_i32_9 : i32
    scf.if %11 {
      %c0_10 = arith.constant 0 : index
      %c0_11 = arith.constant 0 : index
      %12 = vector.load %arg5[%c0_10, %c0_11] : memref<16x512xf32, #tpu.memory_space<vmem>>, vector<16x512xf32>
      %c0_12 = arith.constant 0 : index
      %c0_13 = arith.constant 0 : index
      %13 = vector.load %arg4[%c0_12, %c0_13] : memref<16x512xf32, #tpu.memory_space<vmem>>, vector<16x512xf32>
      tpu.vector_store %arg4[%c0_12, %c0_13], %12 {strides = array<i32>} : memref<16x512xf32, #tpu.memory_space<vmem>>, vector<16x512xf32>,
    } else {
    }
    return
  }
  func.func @transform_0(%arg0: i32, %arg1: i32) -> (i32, i32) {
    %c1_i32 = arith.constant 1 : i32
    %0 = arith.muli %arg0, %c1_i32 : i32
    %1 = arith.addi %0, %arg1 : i32
    %c0_i32 = arith.constant 0 : i32
    %c0_i32_0 = arith.constant 0 : i32
    return %c0_i32, %1 : i32, i32
  }
  func.func @transform_1(%arg0: i32, %arg1: i32) -> (i32, i32) {
    %c1_i32 = arith.constant 1 : i32
    %0 = arith.muli %arg0, %c1_i32 : i32
    %1 = arith.addi %0, %arg1 : i32
    %c0_i32 = arith.constant 0 : i32
    %c0_i32_0 = arith.constant 0 : i32
    return %1, %c0_i32 : i32, i32
  }
  func.func @transform_2(%arg0: i32, %arg1: i32) -> (i32, i32) {
    %c0_i32 = arith.constant 0 : i32
    %c0_i32_0 = arith.constant 0 : i32
    return %arg0, %c0_i32 : i32, i32
  }
}

module attributes {stable_mosaic.version = 11 : i64} {
  func.func @_epilogue_kernel(%arg0: memref<32x512xf32, #tpu.memory_space<vmem>>, %arg1: memref<1x512xf32, #tpu.memory_space<vmem>>, %arg2: memref<512x128xbf16, #tpu.memory_space<vmem>>, %arg3: memref<1x128xf32, #tpu.memory_space<vmem>>, %arg4: memref<128x128xbf16, #tpu.memory_space<vmem>>, %arg5: memref<1x128xf32, #tpu.memory_space<vmem>>, %arg6: memref<16x128xf32, #tpu.memory_space<vmem>>, %arg7: memref<16x128xf32, #tpu.memory_space<vmem>>) attributes {dimension_semantics = [], scalar_prefetch = 0 : i64, scratch_operands = 0 : i64, tpu.core_type = #tpu.core_type<tc>} {
    %c0 = arith.constant 0 : index
    %c0_0 = arith.constant 0 : index
    %0 = vector.load %arg0[%c0, %c0_0] : memref<32x512xf32, #tpu.memory_space<vmem>>, vector<16x512xf32>
    %c16 = arith.constant 16 : index
    %c0_1 = arith.constant 0 : index
    %1 = vector.load %arg0[%c16, %c0_1] : memref<32x512xf32, #tpu.memory_space<vmem>>, vector<16x512xf32>
    %2 = arith.addf %0, %1 : vector<16x512xf32>
    %c0_2 = arith.constant 0 : index
    %c0_3 = arith.constant 0 : index
    %3 = vector.load %arg1[%c0_2, %c0_3] : memref<1x512xf32, #tpu.memory_space<vmem>>, vector<1x512xf32>
    %4 = vector.broadcast %3 : vector<1x512xf32> to vector<16x512xf32>
    %5 = arith.addf %2, %4 : vector<16x512xf32>
    %cst = arith.constant 0.000000e+00 : f32
    %6 = vector.broadcast %cst : f32 to vector<16x512xf32>
    %7 = arith.maximumf %5, %6 : vector<16x512xf32>
    %8 = arith.truncf %7 : vector<16x512xf32> to vector<16x512xbf16>
    %c0_4 = arith.constant 0 : index
    %c0_5 = arith.constant 0 : index
    %9 = vector.load %arg2[%c0_4, %c0_5] : memref<512x128xbf16, #tpu.memory_space<vmem>>, vector<512x128xbf16>
    %cst_6 = arith.constant dense<0.000000e+00> : vector<16x128xf32>
    %10 = tpu.matmul %8, %9, %cst_6 {dimension_numbers = #tpu.dot_dimension_numbers<[1], [0], [0], [1], [0, 0, 1, 1], [], []>} : vector<16x512xbf16>, vector<512x128xbf16>, vector<16x128xf32> -> vector<16x128xf32>
    %c0_7 = arith.constant 0 : index
    %c0_8 = arith.constant 0 : index
    %11 = vector.load %arg3[%c0_7, %c0_8] : memref<1x128xf32, #tpu.memory_space<vmem>>, vector<1x128xf32>
    %12 = vector.broadcast %11 : vector<1x128xf32> to vector<16x128xf32>
    %13 = arith.addf %10, %12 : vector<16x128xf32>
    %14 = arith.truncf %13 : vector<16x128xf32> to vector<16x128xbf16>
    %c0_9 = arith.constant 0 : index
    %c0_10 = arith.constant 0 : index
    %15 = vector.load %arg4[%c0_9, %c0_10] : memref<128x128xbf16, #tpu.memory_space<vmem>>, vector<128x128xbf16>
    %cst_11 = arith.constant dense<0.000000e+00> : vector<16x128xf32>
    %16 = tpu.matmul %14, %15, %cst_11 {dimension_numbers = #tpu.dot_dimension_numbers<[1], [0], [0], [1], [0, 0, 1, 1], [], []>} : vector<16x128xbf16>, vector<128x128xbf16>, vector<16x128xf32> -> vector<16x128xf32>
    %c0_12 = arith.constant 0 : index
    %c0_13 = arith.constant 0 : index
    %17 = vector.load %arg5[%c0_12, %c0_13] : memref<1x128xf32, #tpu.memory_space<vmem>>, vector<1x128xf32>
    %18 = vector.broadcast %17 : vector<1x128xf32> to vector<16x128xf32>
    %19 = arith.addf %16, %18 : vector<16x128xf32>
    %c0_14 = arith.constant 0 : index
    %c0_15 = arith.constant 0 : index
    %20 = vector.load %arg6[%c0_14, %c0_15] : memref<16x128xf32, #tpu.memory_space<vmem>>, vector<16x128xf32>
    tpu.vector_store %arg6[%c0_14, %c0_15], %13 {strides = array<i32>} : memref<16x128xf32, #tpu.memory_space<vmem>>, vector<16x128xf32>,
    %c0_16 = arith.constant 0 : index
    %c0_17 = arith.constant 0 : index
    %21 = vector.load %arg7[%c0_16, %c0_17] : memref<16x128xf32, #tpu.memory_space<vmem>>, vector<16x128xf32>
    tpu.vector_store %arg7[%c0_16, %c0_17], %19 {strides = array<i32>} : memref<16x128xf32, #tpu.memory_space<vmem>>, vector<16x128xf32>,
    return
  }
}

</mosaic_0001>

<bundles_post_ra>
// kernel: age_estimation_forward.3
= control target key start
LH: loop header
LB: loop body
LE: loop exit
PB: predicated region body
PF: predicated region fallthrough
CT: control target
= control target key end

     0   :  { %v52_v21 = vlaneseq  ;;  %v719_v45 = vmov 0.0   ;;  %vm720_vm0 = vmmov 0   ;;  %s959_s2 = inlined_call_operand.vmem [shape: bf16[512,128], index: 2, kind: input, shape index: {}]   ;;  %s960_s0 = inlined_call_operand.vmem [shape: f32[32,512], index: 0, kind: input, shape index: {}]   ;;  %s961_s1 = inlined_call_operand.vmem [shape: f32[1,512], index: 1, kind: input, shape index: {}]   ;;  %s962_s4 = inlined_call_operand.vmem [shape: bf16[128,128], index: 4, kind: input, shape index: {}]   ;;  %s963_s3 = inlined_call_operand.vmem [shape: f32[1,128], index: 3, kind: input, shape index: {}]   ;;  %s964_s6 = inlined_call_operand.vmem [shape: f32[16,128], index: 6, kind: output, shape index: {0}]   ;;  %s965_s5 = inlined_call_operand.vmem [shape: f32[1,128], index: 5, kind: input, shape index: {}]   ;;  %s966_s7 = inlined_call_operand.vmem [shape: f32[16,128], index: 7, kind: output, shape index: {1}]  }
   0x1   :  { %v679_v0 = vld [vmem:[%s959_s2 + $0x40] sm:$0xff]   ;;  %v683_v4 = vld [vmem:[%s959_s2 + $0x48] sm:$0xff]   ;;  %v687_v8 = vld [vmem:[%s959_s2 + $0x50] sm:$0xff]  }
   0x2   :  { %v680_v1 = vld [vmem:[%s959_s2 + $0xc0] sm:$0xff]   ;;  %604 = vmatprep.subr.bf16.mxu0 %v679_v0  ;;  %v684_v5 = vld [vmem:[%s959_s2 + $0xc8] sm:$0xff]   ;;  %v688_v9 = vld [vmem:[%s959_s2 + $0xd0] sm:$0xff]   ;;  %v53_v26 = vshrl.u32 %v52_v21, 7 }
   0x3   :  { %v681_v2 = vld [vmem:[%s959_s2] sm:$0xff]   ;;  %626 = vmatprep.subr.bf16.mxu1 %v680_v1  ;;  %v685_v6 = vld [vmem:[%s959_s2 + $0x8] sm:$0xff]   ;;  %v689_v10 = vld [vmem:[%s959_s2 + $0x10] sm:$0xff]  }
   0x4   :  { %v682_v3 = vld [vmem:[%s959_s2 + $0x80] sm:$0xff]   ;;  %605 = vmatpush3.bf16.msra.mxu0 %v681_v2  ;;  %v686_v7 = vld [vmem:[%s959_s2 + $0x88] sm:$0xff]   ;;  %v690_v11 = vld [vmem:[%s959_s2 + $0x90] sm:$0xff]   ;;  %v58_v31 = vsub.s32 1, %v53_v26  ;;  %v66_v33 = vsub.s32 3, %v53_v26  ;;  %v54_v35 = vsub.s32 0, %v53_v26 }
   0x5   :  { %627 = vmatpush3.bf16.msra.mxu1 %v682_v3  ;;  %606 = vmatprep.subr.bf16.mxu0 %v683_v4  ;;  %v691_v12 = vld [vmem:[%s959_s2 + $0x58] sm:$0xff]   ;;  %v695_v16 = vld [vmem:[%s959_s2 + $0x60] sm:$0xff]   ;;  %v699_v20 = vld [vmem:[%s959_s2 + $0x68] sm:$0xff]   ;;  %v62_v40 = vsub.s32 2, %v53_v26 }
   0x6   :  { %628 = vmatprep.subr.bf16.mxu1 %v684_v5  ;;  %v692_v13 = vld [vmem:[%s959_s2 + $0xd8] sm:$0xff]   ;;  %v696_v17 = vld [vmem:[%s959_s2 + $0xe0] sm:$0xff]   ;;  %v700_v22 = vld [vmem:[%s959_s2 + $0xe8] sm:$0xff]  }
   0x7   :  { %v693_v14 = vld [vmem:[%s959_s2 + $0x18] sm:$0xff]   ;;  %v697_v18 = vld [vmem:[%s959_s2 + $0x20] sm:$0xff]   ;;  %v701_v23 = vld [vmem:[%s959_s2 + $0x28] sm:$0xff]  }
   0x8   :  { %607 = vmatpush3.bf16.msra.mxu0 %v685_v6  ;;  %v694_v15 = vld [vmem:[%s959_s2 + $0x98] sm:$0xff]   ;;  %v698_v19 = vld [vmem:[%s959_s2 + $0xa0] sm:$0xff]   ;;  %v702_v24 = vld [vmem:[%s959_s2 + $0xa8] sm:$0xff]  }
   0x9   :  { %629 = vmatpush3.bf16.msra.mxu1 %v686_v7  ;;  %608 = vmatprep.subr.bf16.mxu0 %v687_v8  ;;  %v703_v25 = vld [vmem:[%s959_s2 + $0x70] sm:$0xff]   ;;  %v707_v30 = vld [vmem:[%s959_s2 + $0x78] sm:$0xff]   ;;  %v27_v37 = vld [vmem:[%s960_s0 + $0x8] sm:$0xff] }
   0xa   :  { %630 = vmatprep.subr.bf16.mxu1 %v688_v9  ;;  %v704_v27 = vld [vmem:[%s959_s2 + $0xf0] sm:$0xff]   ;;  %v708_v32 = vld [vmem:[%s959_s2 + $0xf8] sm:$0xff]   ;;  %v31_v38 = vld [vmem:[%s960_s0 + $0x28] sm:$0xff] }
   0xb   :  { %v705_v28 = vld [vmem:[%s959_s2 + $0x30] sm:$0xff]   ;;  %v709_v34 = vld [vmem:[%s959_s2 + $0x38] sm:$0xff]   ;;  %v35_v39 = vld [vmem:[%s960_s0 + $0x48] sm:$0xff] }
   0xc   :  { %609 = vmatpush3.bf16.msra.mxu0 %v689_v10  ;;  %v706_v29 = vld [vmem:[%s959_s2 + $0xb0] sm:$0xff]   ;;  %v710_v36 = vld [vmem:[%s959_s2 + $0xb8] sm:$0xff]   ;;  %v39_v41 = vld [vmem:[%s960_s0 + $0x68] sm:$0xff]  ;;  %v43_v42 = vadd.f32 %v35_v39, %v27_v37 }
   0xd   :  { %631 = vmatpush3.bf16.msra.mxu1 %v690_v11  ;;  %610 = vmatprep.subr.bf16.mxu0 %v691_v12  ;;  %v50_v43 = vld [vmem:[%s961_s1] sm:$0xf]  ;;  %v29_v44 = vld [vmem:[%s960_s0 + $0x18] sm:$0xff]  ;;  %v47_v46 = vadd.f32 %v39_v41, %v31_v38  ;;  %v28_v62 = vld [vmem:[%s960_s0 + $0x10] sm:$0xff] }
   0xe   :  { %632 = vmatprep.subr.bf16.mxu1 %v692_v13  ;;  %v59_v47 = vrot.slane %v50_v43, %v58_v31  ;;  %v33_v48 = vld [vmem:[%s960_s0 + $0x38] sm:$0xff]  ;;  %v67_v51 = vrot.slane %v50_v43, %v66_v33  ;;  %v55_v52 = vrot.slane %v50_v43, %v54_v35  ;;  %v26_v55 = vld [vmem:[%s960_s0] sm:$0xff]  ;;  %v32_v63 = vld [vmem:[%s960_s0 + $0x30] sm:$0xff]  ;;  %v63_v0 = vrot.slane %v50_v43, %v62_v40 }
   0xf   :  { %v37_v49 = vld [vmem:[%s960_s0 + $0x58] sm:$0xff]  ;;  %v30_v56 = vld [vmem:[%s960_s0 + $0x20] sm:$0xff]  ;;  %v36_v4 = vld [vmem:[%s960_s0 + $0x50] sm:$0xff] }
  0x10   :  { %611 = vmatpush3.bf16.msra.mxu0 %v693_v14  ;;  %v41_v50 = vld [vmem:[%s960_s0 + $0x78] sm:$0xff]  ;;  %v45_v53 = vadd.f32 %v37_v49, %v29_v44  ;;  %v34_v57 = vld [vmem:[%s960_s0 + $0x40] sm:$0xff]  ;;  %v73_v58 = vadd.f32 %v59_v47, %v43_v42  ;;  %v77_v59 = vadd.f32 %v59_v47, %v47_v46  ;;  %v40_v5 = vld [vmem:[%s960_s0 + $0x70] sm:$0xff]  ;;  %v44_v9 = vadd.f32 %v36_v4, %v28_v62 }
  0x11   :  { %633 = vmatpush3.bf16.msra.mxu1 %v694_v15  ;;  %612 = vmatprep.subr.bf16.mxu0 %v695_v16  ;;  %v49_v54 = vadd.f32 %v41_v50, %v33_v48  ;;  %v38_v60 = vld [vmem:[%s960_s0 + $0x60] sm:$0xff]  ;;  %v42_v61 = vadd.f32 %v34_v57, %v26_v55  ;;  %v48_v13 = vadd.f32 %v40_v5, %v32_v63  ;;  %v713_v26 = vld [vmem:[%s962_s4 + $0x10] sm:$0xff]   ;;  %v718_v31 = vld [vmem:[%s962_s4 + $0x38] sm:$0xff]  }
  0x12   :  { %634 = vmatprep.subr.bf16.mxu1 %v696_v17  ;;  %v75_v1 = vadd.f32 %v67_v51, %v45_v53  ;;  %v46_v3 = vadd.f32 %v38_v60, %v30_v56  ;;  %v81_v6 = vmax.f32 %v73_v58, 0.0  ;;  %v85_v7 = vmax.f32 %v77_v59, 0.0  ;;  %v711_v21 = vld [vmem:[%s962_s4] sm:$0xff]  }
  0x13   :  { %v79_v2 = vadd.f32 %v67_v51, %v49_v54  ;;  %v72_v8 = vadd.f32 %v55_v52, %v42_v61  ;;  %v74_v16 = vadd.f32 %v63_v0, %v44_v9  ;;  %v562_v33 = vld [vmem:[%s963_s3] ss:$0 sm:$0xff] }
  0x14   :  { %613 = vmatpush3.bf16.msra.mxu0 %v697_v18  ;;  %v83_v10 = vmax.f32 %v75_v1, 0.0  ;;  %v76_v12 = vadd.f32 %v55_v52, %v46_v3  ;;  %v89_v14 = vpack.c.bf16 %v85_v7, %v81_v6  ;;  %v595_v50 = vld [vmem:[%s965_s5] ss:$0 sm:$0xff] }
  0x15   :  { %635 = vmatpush3.bf16.msra.mxu1 %v698_v19  ;;  %614 = vmatprep.subr.bf16.mxu0 %v699_v20  ;;  %v87_v11 = vmax.f32 %v79_v2, 0.0  ;;  %v80_v15 = vmax.f32 %v72_v8, 0.0  ;;  %v78_v19 = vadd.f32 %v63_v0, %v48_v13  ;;  %v82_v20 = vmax.f32 %v74_v16, 0.0 }
  0x16   :  { %636 = vmatprep.subr.bf16.mxu1 %v700_v22  ;;  %v84_v18 = vmax.f32 %v76_v12, 0.0  ;;  %387 = vmatprep.mubr.bf16.mxu0 %v89_v14 }
  0x17   :  { %v91_v17 = vpack.c.bf16 %v87_v11, %v83_v10 }
  0x18   :  { %615 = vmatpush3.bf16.msra.mxu0 %v701_v23  ;;  %v88_v22 = vpack.c.bf16 %v84_v18, %v80_v15  ;;  %v86_v23 = vmax.f32 %v78_v19, 0.0 }
  0x19   :  { %637 = vmatpush3.bf16.msra.mxu1 %v702_v24  ;;  %616 = vmatprep.subr.bf16.mxu0 %v703_v25  ;;  %v712_v25 = vld [vmem:[%s962_s4 + $0x8] sm:$0xff]  }
  0x1a   :  { %638 = vmatprep.subr.bf16.mxu1 %v704_v27  ;;  %428 = vmatprep.mubr.bf16.mxu1 %v91_v17  ;;  %v90_v24 = vpack.c.bf16 %v86_v23, %v82_v20  ;;  %v714_v27 = vld [vmem:[%s962_s4 + $0x18] sm:$0xff]  }
  0x1c   :  { %617 = vmatpush3.bf16.msra.mxu0 %v705_v28  ;;  %v715_v28 = vld [vmem:[%s962_s4 + $0x20] sm:$0xff]  }
  0x1d   :  { %639 = vmatpush3.bf16.msra.mxu1 %v706_v29  ;;  %618 = vmatprep.subr.bf16.mxu0 %v707_v30  ;;  %v716_v29 = vld [vmem:[%s962_s4 + $0x28] sm:$0xff]   ;;  %v717_v30 = vld [vmem:[%s962_s4 + $0x30] sm:$0xff]  }
  0x1e   :  { %640 = vmatprep.subr.bf16.mxu1 %v708_v32 }
  0x20   :  { %619 = vmatpush3.bf16.msra.mxu0 %v709_v34 }
  0x21   :  { %641 = vmatpush3.bf16.msra.mxu1 %v710_v36  ;;  %657 = vmatprep.subr.bf16.mxu0 %v719_v45 }
  0x23   :  { %388 = vmatmul.mubr.bf16.vlgmr.msra.gmra.mrb[0].mxu0 %v88_v22 }
  0x24   :  { %658 = vmatpush3.bf16.msra.mxu0 %v711_v21  ;;  %429 = vmatmul.mubr.bf16.vlgmr.msra.gmra.mrb[0].mxu1 %v90_v24 }
  0x25   :  { %659 = vmatprep.subr.bf16.mxu0 %v719_v45  ;;  %673 = vmatprep.mubr.msk.bf16.mxu0 %vm720_vm0, %v719_v45 }
  0x28   :  { %660 = vmatpush3.bf16.msra.mxu0 %v712_v25 }
  0x29   :  { %661 = vmatprep.subr.bf16.mxu0 %v719_v45 }
  0x2c   :  { %662 = vmatpush3.bf16.msra.mxu0 %v713_v26 }
  0x2d   :  { %663 = vmatprep.subr.bf16.mxu0 %v719_v45 }
  0x30   :  { %664 = vmatpush3.bf16.msra.mxu0 %v714_v27 }
  0x31   :  { %665 = vmatprep.subr.bf16.mxu0 %v719_v45 }
  0x34   :  { %666 = vmatpush3.bf16.msra.mxu0 %v715_v28 }
  0x35   :  { %667 = vmatprep.subr.bf16.mxu0 %v719_v45 }
  0x38   :  { %668 = vmatpush3.bf16.msra.mxu0 %v716_v29 }
  0x39   :  { %669 = vmatprep.subr.bf16.mxu0 %v719_v45 }
  0x3c   :  { %670 = vmatpush3.bf16.msra.mxu0 %v717_v30 }
  0x3d   :  { %671 = vmatprep.subr.bf16.mxu0 %v719_v45 }
  0x40   :  { %672 = vmatpush3.bf16.msra.mxu0 %v718_v31 }
  0xf6   :  { %v620_v32 = vpop.f32.mrb[0].mxu0 }
  0xf7   :  { %v621_v34 = vpop.f32.mrb[1].mxu0  ;;  %v642_v35 = vpop.f32.mrb[0].mxu1 }
  0xf8   :  { %v622_v36 = vadd.f32 %v621_v34, %v620_v32  ;;  %v623_v37 = vpop.f32.mrb[2].mxu0  ;;  %v643_v38 = vpop.f32.mrb[1].mxu1 }
  0xf9   :  { %v624_v39 = vpop.f32.mrb[3].mxu0  ;;  %v644_v41 = vadd.f32 %v643_v38, %v642_v35  ;;  %v645_v42 = vpop.f32.mrb[2].mxu1 }
  0xfa   :  { %v390_v40 = vadd.f32 %v622_v36, %v562_v33  ;;  %v625_v43 = vadd.f32 %v624_v39, %v623_v37  ;;  %v646_v44 = vpop.f32.mrb[3].mxu1 }
  0xfb   :  { %v647_v48 = vadd.f32 %v646_v44, %v645_v42 }
  0xfc   :  { %v431_v46 = vadd.f32 %v644_v41, %v390_v40  ;;  %v393_v47 = vadd.f32 %v625_v43, %v562_v33 }
  0xfe   :  { %550 = vst [vmem:[%s964_s6] sm:$0xff] %v431_v46  ;;  %v434_v45 = vadd.f32 %v647_v48, %v393_v47 }
 0x100   :  { %v437_v49 = vpack.c.bf16 %v434_v45, %v431_v46  ;;  %551 = vst [vmem:[%s964_s6 + $0x8] sm:$0xff] %v434_v45 }
 0x102   :  { %674 = vmatmul.mubr.bf16.vlgmr.msra.gmra.mrb[4].mxu0 %v437_v49 }
 0x1d5   :  { %v543_v51 = vpop.f32.mrb[4].mxu0 }
 0x1d6   :  { %v544_v52 = vadd.f32 %v595_v50, %v543_v51  ;;  %v675_v53 = vpop.f32.mrb[5].mxu0 }
 0x1d7   :  { %v546_v54 = vpop.f32.mrb[6].mxu0 }
 0x1d8   :  { %552 = vst [vmem:[%s966_s7] sm:$0xff] %v544_v52  ;;  %v547_v55 = vadd.f32 %v595_v50, %v546_v54  ;;  %v676_v56 = vpop.f32.mrb[7].mxu0 }
 0x1da   :  { %553 = vst [vmem:[%s966_s7 + $0x8] sm:$0xff] %v547_v55 }

// kernel: age_estimation_forward.2
= control target key start
LH: loop header
LB: loop body
LE: loop exit
PB: predicated region body
PF: predicated region fallthrough
CT: control target
= control target key end

     0   :  { %7 = vsyncpa [#allocation5], 0  ;;  %s3582_s0 = inlined_call_operand.vmem [shape: bf16[16,2048], index: 0, kind: input, shape index: {}]   ;;  %s3583_s1 = inlined_call_operand.hbm [shape: bf16[2048,512], index: 1, kind: input, shape index: {}]   ;;  %s3584_s2 = inlined_call_operand.vmem [shape: f32[32,512], index: 2, kind: output, shape index: {}]  }
   0x1   :  { %9 = vsyncpa [#allocation5 + $0x1], 0  ;;  %s3170_s9 = smov 0   ;;  %s3172_s10 = smov 0  }
   0x2   :  { %s3174_s11 = smov 0   ;;  %s3176_s12 = smov 0  }
   0x3   :  { %s3178_s13 = smov 0   ;;  %s3180_s14 = smov 0  }
   0x4 LB: > { %s2325_s15 = sadd.s32 4294967295, %s3150_s14   ;;  %s27_s16 = sadd.s32 1, %s3146_s13  ;;  %s3150_s14 = sphi %s3180_s14, %s15_s14   ;;  %s3146_s13 = sphi %s3178_s13, %s3591_s13   ;;  %s3142_s12 = sphi %s3176_s12, %s3590_s12   ;;  %s3138_s11 = sphi %s3174_s11, %s3589_s11   ;;  %s3134_s10 = sphi %s3172_s10, %s3588_s10   ;;  %s3130_s9 = sphi %s3170_s9, %s3587_s9  }
   0x5   : > { %p29_p0 = scmp.ge.s32.totalorder %s27_s16, 2  ;;  %s36_s17 = sadd.s32 1, %s3138_s11 }
   0x6   : > { %p43_p1 = scmp.ne.s32.totalorder %s3138_s11, %s3134_s10  ;;  %p44_p2 = scmp.eq.s32.totalorder %s3150_s14, 0 }
   0x7   : > { %s3593_s16 = smov (%p29_p0, %s27_s16), 0  ;;  %p77_p4 = scmp.ne.s32.totalorder %s3134_s10, %s3130_s9 }
   0x8   : > { %p3206_p3 = por %p44_p2, %p43_p1  ;;  %s33_s19 = ssub.s32 %s3146_s13, %s3593_s16 }
   0x9   : > { %p78_p5 = scmp.eq.s32.totalorder %s2325_s15, 0  ;;  %p34_p6 = scmp.eq.s32.totalorder %s33_s19, 0 }
   0xa   : > { %p2328_p8 = scmp.ge.s32.totalorder %s3150_s14, 2 }
   0xb   : > { %p3213_p7 = por %p78_p5, %p77_p4 }
   0xc   : > { %s3218_s21 = scalar_select %p34_p6, %s3138_s11, %s36_s17  }
   0xd   : > { %123 = sbr.rel (%p2328_p8) target bundleno = 54 (0x36), region = 16 }
  0x14   : > { %126 = sbr.rel (!%p3206_p3) target bundleno = 28 (0x1c), region = 20  ;;  %s128_s22 = sand.u32 (%p3206_p3), 1, %s3138_s11  }
  0x15   : > { %s2608_s23 = sshll.u32 (%p3206_p3), %s3146_s13, 5  ;;  %s2329_s24 = sshll.u32 (%p3206_p3), %s128_s22, 6 }
  0x16   : > { %s134_s27 = scalar_lea.vmem (%p3206_p3), %s3582_s0, %s2608_s23  ;;  %s130_s28 = scalar_lea.vmem (%p3206_p3), [#allocation3], %s2329_s24 }
  0x17   : > { %v147_v0 = vld [vmem:[%s134_s27] sm:$0xff] (%p3206_p3)  ;;  %v149_v1 = vld [vmem:[%s134_s27 + $0x8] sm:$0xff] (%p3206_p3)  ;;  %v151_v2 = vld [vmem:[%s134_s27 + $0x10] sm:$0xff] (%p3206_p3) }
  0x18   : > { %148 = vst [vmem:[%s130_s28] sm:$0xff] (%p3206_p3), %v147_v0  ;;  %150 = vst [vmem:[%s130_s28 + $0x8] sm:$0xff] (%p3206_p3), %v149_v1  ;;  %v153_v3 = vld [vmem:[%s134_s27 + $0x18] sm:$0xff] (%p3206_p3)  ;;  %v155_v4 = vld [vmem:[%s134_s27 + $0x40] sm:$0xff] (%p3206_p3) }
  0x19   : > { %152 = vst [vmem:[%s130_s28 + $0x10] sm:$0xff] (%p3206_p3), %v151_v2  ;;  %v157_v5 = vld [vmem:[%s134_s27 + $0x48] sm:$0xff] (%p3206_p3)  ;;  %154 = vst [vmem:[%s130_s28 + $0x18] sm:$0xff] (%p3206_p3), %v153_v3  ;;  %v159_v6 = vld [vmem:[%s134_s27 + $0x50] sm:$0xff] (%p3206_p3) }
  0x1a   : > { %156 = vst [vmem:[%s130_s28 + $0x20] sm:$0xff] (%p3206_p3), %v155_v4  ;;  %158 = vst [vmem:[%s130_s28 + $0x28] sm:$0xff] (%p3206_p3), %v157_v5  ;;  %v161_v7 = vld [vmem:[%s134_s27 + $0x58] sm:$0xff] (%p3206_p3) }
  0x1b   : > { %160 = vst [vmem:[%s130_s28 + $0x30] sm:$0xff] %v159_v6  ;;  %162 = vst [vmem:[%s130_s28 + $0x38] sm:$0xff] %v161_v7 }
  0x1c PF: > { %s169_s29 = sand.u32 1, %s3138_s11   ;;  %s2610_s30 = sshll.u32 %s3146_s13, 15 }
  0x1d   : > { %s2332_s3 = sshll.u32 %s169_s29, 11  ;;  %s3233_s6 = scalar_lea.hbm %s3583_s1, %s2610_s30 }
  0x1e   : > { %s173_s7 = scalar_lea.vmem [#allocation4], %s2332_s3  ;;  %s3237_s9 = scalar_lea.sflag [#allocation5], %s169_s29 }
  0x1f   : > { %s182_s8 = sshll.u32 %s173_s7, 4  ;;  %s3072_s15 = scalar_lea.hbm %s3233_s6, 32768  ;;  %s3235_s8 = int_to_ptr.vmem [resolvable:$true] %s182_s8 }
  0x20   : > { %p3073_p9 = scmp.ne.s32.totalorder %s3233_s6, %s3072_s15  ;;  %s3076_s22 = scalar_lea.hbm %s3583_s1, 65536 }
  0x21   : > { %p3077_p12 = scmp.lt.u32.totalorder %s3233_s6, %s3583_s1  ;;  %p3078_p13 = scmp.lt.u32.totalorder %s3076_s22, %s3072_s15 }
  0x22   : > { %p3074_p10 = pnand %p3073_p9, %p3206_p3  ;;  %p3080_p1 = scmp.lt.u32.totalorder %s3072_s15, %s3233_s6 }
  0x23   : > { %p3079_p0 = por %p3078_p13, %p3077_p12 }
  0x24   : > { %p3075_p11 = pneg %p3074_p10 }
  0x25   : > { %p3081_p2 = por %p3080_p1, %p3079_p0 }
  0x27   : > { %p3082_p4 = pnand %p3081_p2, %p3075_p11 }
  0x29   : > { %3085 = shalt.err (!%p3082_p4)
}
  0x2a   : > { %s3086_s25 = scalar_lea.vmem %s3235_s8, 32768  ;;  %s3152_s26 = smov [#allocation4]  }
  0x2b   : > { %p3087_p5 = scmp.ne.s32.totalorder %s3235_s8, %s3086_s25  ;;  %s3090_s27 = sshll.u32 %s3152_s26, 4  ;;  %s3091_s27 = int_to_ptr.vmem [resolvable:$false] %s3090_s27 }
  0x2c   : > { %s3092_s28 = scalar_lea.vmem %s3091_s27, 65536  ;;  %p3093_p9 = scmp.lt.s32.totalorder %s3235_s8, %s3091_s27 }
  0x2d   : > { %p3088_p6 = pnand %p3087_p5, %p3206_p3  ;;  %p3094_p10 = scmp.lt.s32.totalorder %s3092_s28, %s3086_s25 }
  0x2f   : > { %p3089_p8 = pneg %p3088_p6  ;;  %p3095_p12 = por %p3094_p10, %p3093_p9 }
  0x31   : > { %p3096_p13 = pnand %p3095_p12, %p3089_p8 }
  0x33   : > { %3099 = shalt.err (!%p3096_p13)
}
  0x34   : > { %s3153_s29 = smov 256   ;;  %s3154_s30 = smov 16  }
  0x35   : > { %2636 = dma.hbm_to_vmem [thread:$0]  (%p3206_p3), %s3233_s6, 32768, %s3235_s8, %s3237_s9, %s3153_s29, %s3153_s29, %s3154_s30  }
  0x36 PF: > { %p2336_p11 = scmp.ge.s32.totalorder %s3150_s14, 1  ;;  %p190_p0 = scmp.lt.s32.totalorder %s3150_s14, 3 }
  0x38   : > { %p191_p1 = pnand %p2336_p11, %p190_p0 }
  0x39   : > { %s197_s3 = sand.u32 (!%p191_p1), 1, %s3134_s10  }
  0x3a   : > { %194 = sbr.rel (%p191_p1) target bundleno = 539 (0x21b), region = 47  ;;  %s2337_s4 = sshll.u32 (!%p191_p1), %s197_s3, 6 }
  0x3b   : > { %s2338_s5 = sshll.u32 (!%p191_p1), %s197_s3, 11  ;;  %s3264_s7 = scalar_lea.vmem (!%p191_p1), [#allocation3], %s2337_s4 }
  0x3c   : > { %s204_s15 = scalar_lea.sflag (!%p191_p1), [#allocation5], %s197_s3  ;;  %s3266_s17 = scalar_lea.vmem (!%p191_p1), [#allocation4], %s2338_s5 }
  0x41   : > { %3125 = dma.done.wait (%p3213_p7), %s204_s15, 32768  }
  0x42   : > { %3127 = vsyncadd (%p3213_p7), %s204_s15, 4294934528  ;;  %v2688_v8 = vld [vmem:[%s3266_s17 + $0x4] ss:$16 sps:$4 sm:$0xff]   ;;  %v2690_v9 = vld [vmem:[%s3266_s17 + $0xc] ss:$16 sps:$4 sm:$0xff]   ;;  %s2339_s18 = sshll.u32 %s3142_s12, 1 }
  0x43   : > { %1848 = vmatprep.subr.bf16.mxu0 %v2688_v8  ;;  %v2692_v10 = vld [vmem:[%s3266_s17] ss:$16 sps:$4 sm:$0xff]   ;;  %v2693_v11 = vld [vmem:[%s3266_s17 + $0x8] ss:$16 sps:$4 sm:$0xff]   ;;  %2020 = vmatprep.subr.bf16.mxu1 %v2690_v9  ;;  %v2694_v12 = vld [vmem:[%s3266_s17 + $0x24] ss:$16 sps:$4 sm:$0xff]  }
  0x44   : > { %1849 = vmatpush1.bf16.msra.mxu0 %v2692_v10  ;;  %2021 = vmatpush1.bf16.msra.mxu1 %v2693_v11  ;;  %v2696_v13 = vld [vmem:[%s3266_s17 + $0x2c] ss:$16 sps:$4 sm:$0xff]   ;;  %v2698_v14 = vld [vmem:[%s3266_s17 + $0x20] ss:$16 sps:$4 sm:$0xff]   ;;  %v2699_v15 = vld [vmem:[%s3266_s17 + $0x28] ss:$16 sps:$4 sm:$0xff]  }
  0x45   : > { %1850 = vmatprep.subr.bf16.mxu0 %v2694_v12  ;;  %2022 = vmatprep.subr.bf16.mxu1 %v2696_v13  ;;  %v2700_v16 = vld [vmem:[%s3266_s17 + $0x44] ss:$16 sps:$4 sm:$0xff]   ;;  %v2702_v17 = vld [vmem:[%s3266_s17 + $0x4c] ss:$16 sps:$4 sm:$0xff]   ;;  %v2704_v18 = vld [vmem:[%s3266_s17 + $0x40] ss:$16 sps:$4 sm:$0xff]  }
  0x46   : > { %v2705_v19 = vld [vmem:[%s3266_s17 + $0x48] ss:$16 sps:$4 sm:$0xff]   ;;  %v2706_v20 = vld [vmem:[%s3266_s17 + $0x64] ss:$16 sps:$4 sm:$0xff]   ;;  %v2708_v21 = vld [vmem:[%s3266_s17 + $0x6c] ss:$16 sps:$4 sm:$0xff]  }
  0x47   : > { %v2710_v22 = vld [vmem:[%s3266_s17 + $0x60] ss:$16 sps:$4 sm:$0xff]   ;;  %v2711_v23 = vld [vmem:[%s3266_s17 + $0x68] ss:$16 sps:$4 sm:$0xff]   ;;  %v2712_v24 = vld [vmem:[%s3266_s17 + $0x84] ss:$16 sps:$4 sm:$0xff]  }
  0x48   : > { %1851 = vmatpush1.bf16.msra.mxu0 %v2698_v14  ;;  %2023 = vmatpush1.bf16.msra.mxu1 %v2699_v15  ;;  %v2714_v25 = vld [vmem:[%s3266_s17 + $0x8c] ss:$16 sps:$4 sm:$0xff]   ;;  %v2716_v26 = vld [vmem:[%s3266_s17 + $0x80] ss:$16 sps:$4 sm:$0xff]   ;;  %v2717_v27 = vld [vmem:[%s3266_s17 + $0x88] ss:$16 sps:$4 sm:$0xff]  }
  0x49   : > { %1852 = vmatprep.subr.bf16.mxu0 %v2700_v16  ;;  %2024 = vmatprep.subr.bf16.mxu1 %v2702_v17  ;;  %v2718_v28 = vld [vmem:[%s3266_s17 + $0xa4] ss:$16 sps:$4 sm:$0xff]   ;;  %v2720_v29 = vld [vmem:[%s3266_s17 + $0xac] ss:$16 sps:$4 sm:$0xff]   ;;  %v2722_v30 = vld [vmem:[%s3266_s17 + $0xa0] ss:$16 sps:$4 sm:$0xff]  }
  0x4a   : > { %v2723_v31 = vld [vmem:[%s3266_s17 + $0xa8] ss:$16 sps:$4 sm:$0xff]   ;;  %v2724_v32 = vld [vmem:[%s3266_s17 + $0xc4] ss:$16 sps:$4 sm:$0xff]   ;;  %v2726_v33 = vld [vmem:[%s3266_s17 + $0xcc] ss:$16 sps:$4 sm:$0xff]  }
  0x4b   : > { %v2728_v34 = vld [vmem:[%s3266_s17 + $0xc0] ss:$16 sps:$4 sm:$0xff]   ;;  %v2729_v35 = vld [vmem:[%s3266_s17 + $0xc8] ss:$16 sps:$4 sm:$0xff]   ;;  %v2730_v36 = vld [vmem:[%s3266_s17 + $0xe4] ss:$16 sps:$4 sm:$0xff]  }
  0x4c   : > { %1853 = vmatpush1.bf16.msra.mxu0 %v2704_v18  ;;  %2025 = vmatpush1.bf16.msra.mxu1 %v2705_v19  ;;  %v2732_v37 = vld [vmem:[%s3266_s17 + $0xec] ss:$16 sps:$4 sm:$0xff]   ;;  %v2734_v38 = vld [vmem:[%s3266_s17 + $0xe0] ss:$16 sps:$4 sm:$0xff]   ;;  %v2735_v39 = vld [vmem:[%s3266_s17 + $0xe8] ss:$16 sps:$4 sm:$0xff]  }
  0x4d   : > { %1854 = vmatprep.subr.bf16.mxu0 %v2706_v20  ;;  %2026 = vmatprep.subr.bf16.mxu1 %v2708_v21  ;;  %v2736_v40 = vld [vmem:[%s3266_s17 + $0x104] ss:$16 sps:$4 sm:$0xff]   ;;  %v2738_v41 = vld [vmem:[%s3266_s17 + $0x10c] ss:$16 sps:$4 sm:$0xff]   ;;  %v2740_v42 = vld [vmem:[%s3266_s17 + $0x100] ss:$16 sps:$4 sm:$0xff]  }
  0x4e   : > { %v2741_v43 = vld [vmem:[%s3266_s17 + $0x108] ss:$16 sps:$4 sm:$0xff]   ;;  %v2742_v44 = vld [vmem:[%s3266_s17 + $0x124] ss:$16 sps:$4 sm:$0xff]   ;;  %v2744_v45 = vld [vmem:[%s3266_s17 + $0x12c] ss:$16 sps:$4 sm:$0xff]  }
  0x4f   : > { %v2746_v46 = vld [vmem:[%s3266_s17 + $0x120] ss:$16 sps:$4 sm:$0xff]   ;;  %v2747_v47 = vld [vmem:[%s3266_s17 + $0x128] ss:$16 sps:$4 sm:$0xff]   ;;  %v2748_v48 = vld [vmem:[%s3266_s17 + $0x144] ss:$16 sps:$4 sm:$0xff]  }
  0x50   : > { %1855 = vmatpush1.bf16.msra.mxu0 %v2710_v22  ;;  %2027 = vmatpush1.bf16.msra.mxu1 %v2711_v23  ;;  %v2750_v49 = vld [vmem:[%s3266_s17 + $0x14c] ss:$16 sps:$4 sm:$0xff]   ;;  %v2752_v50 = vld [vmem:[%s3266_s17 + $0x140] ss:$16 sps:$4 sm:$0xff]   ;;  %v2753_v51 = vld [vmem:[%s3266_s17 + $0x148] ss:$16 sps:$4 sm:$0xff]  }
  0x51   : > { %1856 = vmatprep.subr.bf16.mxu0 %v2712_v24  ;;  %2028 = vmatprep.subr.bf16.mxu1 %v2714_v25  ;;  %v2754_v52 = vld [vmem:[%s3266_s17 + $0x164] ss:$16 sps:$4 sm:$0xff]   ;;  %v2756_v53 = vld [vmem:[%s3266_s17 + $0x16c] ss:$16 sps:$4 sm:$0xff]   ;;  %v2758_v56 = vld [vmem:[%s3266_s17 + $0x160] ss:$16 sps:$4 sm:$0xff]  }
  0x52   : > { %v264_v54 = vld [vmem:[%s3264_s7] sm:$0xff]  ;;  %v2759_v57 = vld [vmem:[%s3266_s17 + $0x168] ss:$16 sps:$4 sm:$0xff]   ;;  %v2762_v60 = vld [vmem:[%s3266_s17 + $0x18c] ss:$16 sps:$4 sm:$0xff]   ;;  %p238_p3 = scmp.lt.s32.totalorder %s2339_s18, 3 }
  0x53   : > { %v268_v55 = vld [vmem:[%s3264_s7 + $0x20] sm:$0xff]  ;;  %v2765_v62 = vld [vmem:[%s3266_s17 + $0x188] ss:$16 sps:$4 sm:$0xff]   ;;  %v2768_v0 = vld [vmem:[%s3266_s17 + $0x1ac] ss:$16 sps:$4 sm:$0xff]  }
  0x54   : > { %1857 = vmatpush1.bf16.msra.mxu0 %v2716_v26  ;;  %2029 = vmatpush1.bf16.msra.mxu1 %v2717_v27  ;;  %v2343_v58 = vcombine.high %v264_v54, %v268_v55  ;;  %v2760_v59 = vld [vmem:[%s3266_s17 + $0x184] ss:$16 sps:$4 sm:$0xff]   ;;  %v2764_v61 = vld [vmem:[%s3266_s17 + $0x180] ss:$16 sps:$4 sm:$0xff]   ;;  %v2771_v2 = vld [vmem:[%s3266_s17 + $0x1a8] ss:$16 sps:$4 sm:$0xff]   ;;  %v2342_v13 = vcombine.low %v264_v54, %v268_v55 }
  0x55   : > { %1858 = vmatprep.subr.bf16.mxu0 %v2718_v28  ;;  %2030 = vmatprep.subr.bf16.mxu1 %v2720_v29  ;;  %v2766_v63 = vld [vmem:[%s3266_s17 + $0x1a4] ss:$16 sps:$4 sm:$0xff]   ;;  %v2770_v1 = vld [vmem:[%s3266_s17 + $0x1a0] ss:$16 sps:$4 sm:$0xff]   ;;  %v2774_v4 = vld [vmem:[%s3266_s17 + $0x1cc] ss:$16 sps:$4 sm:$0xff]  }
  0x56   : > { %1880 = vmatprep.mubr.bf16.mxu0 %v2343_v58  ;;  %2052 = vmatprep.mubr.bf16.mxu1 %v2343_v58  ;;  %v2772_v3 = vld [vmem:[%s3266_s17 + $0x1c4] ss:$16 sps:$4 sm:$0xff]   ;;  %v2776_v5 = vld [vmem:[%s3266_s17 + $0x1c0] ss:$16 sps:$4 sm:$0xff]   ;;  %v2777_v6 = vld [vmem:[%s3266_s17 + $0x1c8] ss:$16 sps:$4 sm:$0xff]  }
  0x57   : > { %v2778_v7 = vld [vmem:[%s3266_s17 + $0x1e4] ss:$16 sps:$4 sm:$0xff]   ;;  %v2780_v8 = vld [vmem:[%s3266_s17 + $0x1ec] ss:$16 sps:$4 sm:$0xff]   ;;  %v2782_v9 = vld [vmem:[%s3266_s17 + $0x1e0] ss:$16 sps:$4 sm:$0xff]  }
  0x58   : > { %1859 = vmatpush1.bf16.msra.mxu0 %v2722_v30  ;;  %2031 = vmatpush1.bf16.msra.mxu1 %v2723_v31  ;;  %v2783_v10 = vld [vmem:[%s3266_s17 + $0x1e8] ss:$16 sps:$4 sm:$0xff]   ;;  %v2786_v11 = vld [vmem:[%s3266_s17 + $0x204] ss:$16 sps:$4 sm:$0xff]   ;;  %v2789_v12 = vld [vmem:[%s3266_s17 + $0x20c] ss:$16 sps:$4 sm:$0xff]  }
  0x59   : > { %1860 = vmatprep.subr.bf16.mxu0 %v2724_v32  ;;  %2032 = vmatprep.subr.bf16.mxu1 %v2726_v33  ;;  %v2784_v14 = vld [vmem:[%s3266_s17 + $0x200] ss:$16 sps:$4 sm:$0xff]   ;;  %v2787_v15 = vld [vmem:[%s3266_s17 + $0x208] ss:$16 sps:$4 sm:$0xff]   ;;  %v2792_v16 = vld [vmem:[%s3266_s17 + $0x224] ss:$16 sps:$4 sm:$0xff]  }
  0x5a   : > { %v2795_v17 = vld [vmem:[%s3266_s17 + $0x22c] ss:$16 sps:$4 sm:$0xff]   ;;  %v2790_v18 = vld [vmem:[%s3266_s17 + $0x220] ss:$16 sps:$4 sm:$0xff]   ;;  %v2793_v19 = vld [vmem:[%s3266_s17 + $0x228] ss:$16 sps:$4 sm:$0xff]  }
  0x5b   : > { %v2798_v20 = vld [vmem:[%s3266_s17 + $0x244] ss:$16 sps:$4 sm:$0xff]   ;;  %v2801_v21 = vld [vmem:[%s3266_s17 + $0x24c] ss:$16 sps:$4 sm:$0xff]   ;;  %v2796_v22 = vld [vmem:[%s3266_s17 + $0x240] ss:$16 sps:$4 sm:$0xff]  }
  0x5c   : > { %1861 = vmatpush1.bf16.msra.mxu0 %v2728_v34  ;;  %2033 = vmatpush1.bf16.msra.mxu1 %v2729_v35  ;;  %v2799_v23 = vld [vmem:[%s3266_s17 + $0x248] ss:$16 sps:$4 sm:$0xff]   ;;  %v2804_v24 = vld [vmem:[%s3266_s17 + $0x264] ss:$16 sps:$4 sm:$0xff]   ;;  %v2807_v25 = vld [vmem:[%s3266_s17 + $0x26c] ss:$16 sps:$4 sm:$0xff]  }
  0x5d   : > { %1862 = vmatprep.subr.bf16.mxu0 %v2730_v36  ;;  %2034 = vmatprep.subr.bf16.mxu1 %v2732_v37  ;;  %v2802_v26 = vld [vmem:[%s3266_s17 + $0x260] ss:$16 sps:$4 sm:$0xff]   ;;  %v2805_v27 = vld [vmem:[%s3266_s17 + $0x268] ss:$16 sps:$4 sm:$0xff]   ;;  %v2810_v28 = vld [vmem:[%s3266_s17 + $0x284] ss:$16 sps:$4 sm:$0xff]  }
  0x5e   : > { %v2813_v29 = vld [vmem:[%s3266_s17 + $0x28c] ss:$16 sps:$4 sm:$0xff]   ;;  %v2808_v30 = vld [vmem:[%s3266_s17 + $0x280] ss:$16 sps:$4 sm:$0xff]   ;;  %v2811_v31 = vld [vmem:[%s3266_s17 + $0x288] ss:$16 sps:$4 sm:$0xff]  }
  0x5f   : > { %v2816_v32 = vld [vmem:[%s3266_s17 + $0x2a4] ss:$16 sps:$4 sm:$0xff]   ;;  %v2819_v33 = vld [vmem:[%s3266_s17 + $0x2ac] ss:$16 sps:$4 sm:$0xff]   ;;  %v2814_v34 = vld [vmem:[%s3266_s17 + $0x2a0] ss:$16 sps:$4 sm:$0xff]  }
  0x60   : > { %1863 = vmatpush1.bf16.msra.mxu0 %v2734_v38  ;;  %2035 = vmatpush1.bf16.msra.mxu1 %v2735_v39  ;;  %v2817_v35 = vld [vmem:[%s3266_s17 + $0x2a8] ss:$16 sps:$4 sm:$0xff]   ;;  %v2822_v36 = vld [vmem:[%s3266_s17 + $0x2c4] ss:$16 sps:$4 sm:$0xff]   ;;  %v2825_v37 = vld [vmem:[%s3266_s17 + $0x2cc] ss:$16 sps:$4 sm:$0xff]  }
  0x61   : > { %1864 = vmatprep.subr.bf16.mxu0 %v2736_v40  ;;  %2036 = vmatprep.subr.bf16.mxu1 %v2738_v41  ;;  %v3365_v38 = vld [vmem:[%s3264_s7 + $0x8] sm:$0xff]  ;;  %v2820_v40 = vld [vmem:[%s3266_s17 + $0x2c0] ss:$16 sps:$4 sm:$0xff]   ;;  %v2846_v55 = vld [vmem:[%s3266_s17 + $0x344] ss:$16 sps:$4 sm:$0xff]   ;;  %s3595_s18 = smov (!%p238_p3, %s2339_s18), 3 }
  0x62   : > { %v3368_v39 = vld [vmem:[%s3264_s7 + $0x28] sm:$0xff]  ;;  %s2611_s20 = sshll.u32 %s3595_s18, 5 }
  0x63   : > { %v2823_v41 = vld [vmem:[%s3266_s17 + $0x2c8] ss:$16 sps:$4 sm:$0xff]   ;;  %s242_s9 = scalar_lea.vmem %s3584_s2, %s2611_s20 }
  0x64   : > { %1865 = vmatpush1.bf16.msra.mxu0 %v2740_v42  ;;  %2037 = vmatpush1.bf16.msra.mxu1 %v2741_v43  ;;  %v2345_v42 = vcombine.high %v3365_v38, %v3368_v39  ;;  %v2828_v43 = vld [vmem:[%s3266_s17 + $0x2e4] ss:$16 sps:$4 sm:$0xff]   ;;  %v2841_v54 = vld [vmem:[%s3266_s17 + $0x328] ss:$16 sps:$4 sm:$0xff]  }
  0x65   : > { %1866 = vmatprep.subr.bf16.mxu0 %v2742_v44  ;;  %2038 = vmatprep.subr.bf16.mxu1 %v2744_v45  ;;  %v2831_v44 = vld [vmem:[%s3266_s17 + $0x2ec] ss:$16 sps:$4 sm:$0xff]   ;;  %v2826_v45 = vld [vmem:[%s3266_s17 + $0x2e0] ss:$16 sps:$4 sm:$0xff]   ;;  %v2847_v58 = vld [vmem:[%s3266_s17 + $0x348] ss:$16 sps:$4 sm:$0xff]  }
  0x68   : > { %1867 = vmatpush1.bf16.msra.mxu0 %v2746_v46  ;;  %2039 = vmatpush1.bf16.msra.mxu1 %v2747_v47  ;;  %v2829_v46 = vld [vmem:[%s3266_s17 + $0x2e8] ss:$16 sps:$4 sm:$0xff]   ;;  %v2834_v47 = vld [vmem:[%s3266_s17 + $0x304] ss:$16 sps:$4 sm:$0xff]  }
  0x69   : > { %1868 = vmatprep.subr.bf16.mxu0 %v2748_v48  ;;  %2040 = vmatprep.subr.bf16.mxu1 %v2750_v49  ;;  %v2837_v48 = vld [vmem:[%s3266_s17 + $0x30c] ss:$16 sps:$4 sm:$0xff]   ;;  %v2832_v49 = vld [vmem:[%s3266_s17 + $0x300] ss:$16 sps:$4 sm:$0xff]  }
  0x6c   : > { %1869 = vmatpush1.bf16.msra.mxu0 %v2752_v50  ;;  %2041 = vmatpush1.bf16.msra.mxu1 %v2753_v51  ;;  %v2835_v50 = vld [vmem:[%s3266_s17 + $0x308] ss:$16 sps:$4 sm:$0xff]   ;;  %v2840_v51 = vld [vmem:[%s3266_s17 + $0x324] ss:$16 sps:$4 sm:$0xff]  }
  0x6d   : > { %1870 = vmatprep.subr.bf16.mxu0 %v2754_v52  ;;  %2042 = vmatprep.subr.bf16.mxu1 %v2756_v53  ;;  %v2843_v52 = vld [vmem:[%s3266_s17 + $0x32c] ss:$16 sps:$4 sm:$0xff]   ;;  %v2838_v53 = vld [vmem:[%s3266_s17 + $0x320] ss:$16 sps:$4 sm:$0xff]  }
  0x70   : > { %1871 = vmatpush1.bf16.msra.mxu0 %v2758_v56  ;;  %2043 = vmatpush1.bf16.msra.mxu1 %v2759_v57  ;;  %v2849_v56 = vld [vmem:[%s3266_s17 + $0x34c] ss:$16 sps:$4 sm:$0xff]   ;;  %v2844_v57 = vld [vmem:[%s3266_s17 + $0x340] ss:$16 sps:$4 sm:$0xff]  }
  0x71   : > { %1872 = vmatprep.subr.bf16.mxu0 %v2760_v59  ;;  %2044 = vmatprep.subr.bf16.mxu1 %v2762_v60  ;;  %v2852_v59 = vld [vmem:[%s3266_s17 + $0x364] ss:$16 sps:$4 sm:$0xff]   ;;  %v2855_v60 = vld [vmem:[%s3266_s17 + $0x36c] ss:$16 sps:$4 sm:$0xff]  }
  0x74   : > { %1873 = vmatpush1.bf16.msra.mxu0 %v2764_v61  ;;  %2045 = vmatpush1.bf16.msra.mxu1 %v2765_v62  ;;  %v2850_v61 = vld [vmem:[%s3266_s17 + $0x360] ss:$16 sps:$4 sm:$0xff]   ;;  %v2853_v62 = vld [vmem:[%s3266_s17 + $0x368] ss:$16 sps:$4 sm:$0xff]  }
  0x75   : > { %1874 = vmatprep.subr.bf16.mxu0 %v2766_v63  ;;  %2046 = vmatprep.subr.bf16.mxu1 %v2768_v0  ;;  %v2858_v63 = vld [vmem:[%s3266_s17 + $0x384] ss:$16 sps:$4 sm:$0xff]   ;;  %v2861_v0 = vld [vmem:[%s3266_s17 + $0x38c] ss:$16 sps:$4 sm:$0xff]  }
  0x78   : > { %1875 = vmatpush1.bf16.msra.mxu0 %v2770_v1  ;;  %2047 = vmatpush1.bf16.msra.mxu1 %v2771_v2  ;;  %v2856_v1 = vld [vmem:[%s3266_s17 + $0x380] ss:$16 sps:$4 sm:$0xff]   ;;  %v2859_v2 = vld [vmem:[%s3266_s17 + $0x388] ss:$16 sps:$4 sm:$0xff]  }
  0x79   : > { %1876 = vmatprep.subr.bf16.mxu0 %v2772_v3  ;;  %2048 = vmatprep.subr.bf16.mxu1 %v2774_v4  ;;  %v2864_v3 = vld [vmem:[%s3266_s17 + $0x3a4] ss:$16 sps:$4 sm:$0xff]   ;;  %v2867_v4 = vld [vmem:[%s3266_s17 + $0x3ac] ss:$16 sps:$4 sm:$0xff]  }
  0x7c   : > { %1877 = vmatpush1.bf16.msra.mxu0 %v2776_v5  ;;  %2049 = vmatpush1.bf16.msra.mxu1 %v2777_v6  ;;  %v2862_v5 = vld [vmem:[%s3266_s17 + $0x3a0] ss:$16 sps:$4 sm:$0xff]   ;;  %v2865_v6 = vld [vmem:[%s3266_s17 + $0x3a8] ss:$16 sps:$4 sm:$0xff]  }
  0x7d   : > { %1878 = vmatprep.subr.bf16.mxu0 %v2778_v7  ;;  %2050 = vmatprep.subr.bf16.mxu1 %v2780_v8  ;;  %v2870_v7 = vld [vmem:[%s3266_s17 + $0x3c4] ss:$16 sps:$4 sm:$0xff]   ;;  %v2873_v8 = vld [vmem:[%s3266_s17 + $0x3cc] ss:$16 sps:$4 sm:$0xff]  }
  0x80   : > { %1879 = vmatpush1.bf16.msra.mxu0 %v2782_v9  ;;  %2051 = vmatpush1.bf16.msra.mxu1 %v2783_v10  ;;  %v2868_v9 = vld [vmem:[%s3266_s17 + $0x3c0] ss:$16 sps:$4 sm:$0xff]   ;;  %v2871_v10 = vld [vmem:[%s3266_s17 + $0x3c8] ss:$16 sps:$4 sm:$0xff]  }
  0x81   : > { %1891 = vmatprep.subr.bf16.mxu0 %v2786_v11  ;;  %2063 = vmatprep.subr.bf16.mxu1 %v2789_v12  ;;  %v2876_v11 = vld [vmem:[%s3266_s17 + $0x3e4] ss:$16 sps:$4 sm:$0xff]   ;;  %v2879_v12 = vld [vmem:[%s3266_s17 + $0x3ec] ss:$16 sps:$4 sm:$0xff]  }
  0x83   : > { %1881 = vmatmul.mubr.bf16.vlgmr.msra.gmra.mrb[0].mxu0 %v2342_v13  ;;  %2053 = vmatmul.mubr.bf16.vlgmr.msra.gmra.mrb[0].mxu1 %v2342_v13  ;;  %v2874_v13 = vld [vmem:[%s3266_s17 + $0x3e0] ss:$16 sps:$4 sm:$0xff]  }
  0x84   : > { %1892 = vmatpush1.bf16.msra.mxu0 %v2784_v14  ;;  %2064 = vmatpush1.bf16.msra.mxu1 %v2787_v15  ;;  %v2877_v14 = vld [vmem:[%s3266_s17 + $0x3e8] ss:$16 sps:$4 sm:$0xff]   ;;  %v2882_v15 = vld [vmem:[%s3266_s17 + $0x404] ss:$16 sps:$4 sm:$0xff]  }
  0x85   : > { %1893 = vmatprep.subr.bf16.mxu0 %v2792_v16  ;;  %2065 = vmatprep.subr.bf16.mxu1 %v2795_v17  ;;  %v2885_v16 = vld [vmem:[%s3266_s17 + $0x40c] ss:$16 sps:$4 sm:$0xff]   ;;  %v2344_v17 = vcombine.low %v3365_v38, %v3368_v39  ;;  %v2907_v38 = vld [vmem:[%s3266_s17 + $0x488] ss:$16 sps:$4 sm:$0xff]   ;;  %v2912_v39 = vld [vmem:[%s3266_s17 + $0x4a4] ss:$16 sps:$4 sm:$0xff]  }
  0x86   : > { %1923 = vmatprep.mubr.bf16.mxu0 %v2345_v42  ;;  %2095 = vmatprep.mubr.bf16.mxu1 %v2345_v42  ;;  %v2913_v42 = vld [vmem:[%s3266_s17 + $0x4a8] ss:$16 sps:$4 sm:$0xff]  }
  0x88   : > { %1894 = vmatpush1.bf16.msra.mxu0 %v2790_v18  ;;  %2066 = vmatpush1.bf16.msra.mxu1 %v2793_v19  ;;  %v2880_v18 = vld [vmem:[%s3266_s17 + $0x400] ss:$16 sps:$4 sm:$0xff]   ;;  %v2883_v19 = vld [vmem:[%s3266_s17 + $0x408] ss:$16 sps:$4 sm:$0xff]  }
  0x89   : > { %1895 = vmatprep.subr.bf16.mxu0 %v2798_v20  ;;  %2067 = vmatprep.subr.bf16.mxu1 %v2801_v21  ;;  %v2888_v20 = vld [vmem:[%s3266_s17 + $0x424] ss:$16 sps:$4 sm:$0xff]   ;;  %v2891_v21 = vld [vmem:[%s3266_s17 + $0x42c] ss:$16 sps:$4 sm:$0xff]  }
  0x8c   : > { %1896 = vmatpush1.bf16.msra.mxu0 %v2796_v22  ;;  %2068 = vmatpush1.bf16.msra.mxu1 %v2799_v23  ;;  %v3419_v22 = vld [vmem:[%s3264_s7 + $0x10] sm:$0xff] }
  0x8d   : > { %1897 = vmatprep.subr.bf16.mxu0 %v2804_v24  ;;  %2069 = vmatprep.subr.bf16.mxu1 %v2807_v25  ;;  %v3422_v23 = vld [vmem:[%s3264_s7 + $0x30] sm:$0xff] }
  0x8e   : > { %v2347_v24 = vcombine.high %v3419_v22, %v3422_v23  ;;  %v2886_v25 = vld [vmem:[%s3266_s17 + $0x420] ss:$16 sps:$4 sm:$0xff]  }
  0x90   : > { %1898 = vmatpush1.bf16.msra.mxu0 %v2802_v26  ;;  %2070 = vmatpush1.bf16.msra.mxu1 %v2805_v27  ;;  %v2889_v26 = vld [vmem:[%s3266_s17 + $0x428] ss:$16 sps:$4 sm:$0xff]   ;;  %v2894_v27 = vld [vmem:[%s3266_s17 + $0x444] ss:$16 sps:$4 sm:$0xff]  }
  0x91   : > { %1899 = vmatprep.subr.bf16.mxu0 %v2810_v28  ;;  %2071 = vmatprep.subr.bf16.mxu1 %v2813_v29  ;;  %v2897_v28 = vld [vmem:[%s3266_s17 + $0x44c] ss:$16 sps:$4 sm:$0xff]   ;;  %v2892_v29 = vld [vmem:[%s3266_s17 + $0x440] ss:$16 sps:$4 sm:$0xff]  }
  0x94   : > { %1900 = vmatpush1.bf16.msra.mxu0 %v2808_v30  ;;  %2072 = vmatpush1.bf16.msra.mxu1 %v2811_v31  ;;  %v2895_v30 = vld [vmem:[%s3266_s17 + $0x448] ss:$16 sps:$4 sm:$0xff]   ;;  %v2900_v31 = vld [vmem:[%s3266_s17 + $0x464] ss:$16 sps:$4 sm:$0xff]  }
  0x95   : > { %1901 = vmatprep.subr.bf16.mxu0 %v2816_v32  ;;  %2073 = vmatprep.subr.bf16.mxu1 %v2819_v33  ;;  %v2903_v32 = vld [vmem:[%s3266_s17 + $0x46c] ss:$16 sps:$4 sm:$0xff]   ;;  %v2898_v33 = vld [vmem:[%s3266_s17 + $0x460] ss:$16 sps:$4 sm:$0xff]  }
  0x98   : > { %1902 = vmatpush1.bf16.msra.mxu0 %v2814_v34  ;;  %2074 = vmatpush1.bf16.msra.mxu1 %v2817_v35  ;;  %v2901_v34 = vld [vmem:[%s3266_s17 + $0x468] ss:$16 sps:$4 sm:$0xff]   ;;  %v2906_v35 = vld [vmem:[%s3266_s17 + $0x484] ss:$16 sps:$4 sm:$0xff]  }
  0x99   : > { %1903 = vmatprep.subr.bf16.mxu0 %v2822_v36  ;;  %2075 = vmatprep.subr.bf16.mxu1 %v2825_v37  ;;  %v2909_v36 = vld [vmem:[%s3266_s17 + $0x48c] ss:$16 sps:$4 sm:$0xff]   ;;  %v2904_v37 = vld [vmem:[%s3266_s17 + $0x480] ss:$16 sps:$4 sm:$0xff]  }
  0x9c   : > { %1904 = vmatpush1.bf16.msra.mxu0 %v2820_v40  ;;  %2076 = vmatpush1.bf16.msra.mxu1 %v2823_v41  ;;  %v2915_v40 = vld [vmem:[%s3266_s17 + $0x4ac] ss:$16 sps:$4 sm:$0xff]   ;;  %v2910_v41 = vld [vmem:[%s3266_s17 + $0x4a0] ss:$16 sps:$4 sm:$0xff]  }
  0x9d   : > { %1905 = vmatprep.subr.bf16.mxu0 %v2828_v43  ;;  %2077 = vmatprep.subr.bf16.mxu1 %v2831_v44  ;;  %v2918_v43 = vld [vmem:[%s3266_s17 + $0x4c4] ss:$16 sps:$4 sm:$0xff]   ;;  %v2921_v44 = vld [vmem:[%s3266_s17 + $0x4cc] ss:$16 sps:$4 sm:$0xff]  }
  0xa0   : > { %1906 = vmatpush1.bf16.msra.mxu0 %v2826_v45  ;;  %2078 = vmatpush1.bf16.msra.mxu1 %v2829_v46  ;;  %v2916_v45 = vld [vmem:[%s3266_s17 + $0x4c0] ss:$16 sps:$4 sm:$0xff]   ;;  %v2919_v46 = vld [vmem:[%s3266_s17 + $0x4c8] ss:$16 sps:$4 sm:$0xff]  }
  0xa1   : > { %1907 = vmatprep.subr.bf16.mxu0 %v2834_v47  ;;  %2079 = vmatprep.subr.bf16.mxu1 %v2837_v48  ;;  %v2924_v47 = vld [vmem:[%s3266_s17 + $0x4e4] ss:$16 sps:$4 sm:$0xff]   ;;  %v2927_v48 = vld [vmem:[%s3266_s17 + $0x4ec] ss:$16 sps:$4 sm:$0xff]  }
  0xa4   : > { %1908 = vmatpush1.bf16.msra.mxu0 %v2832_v49  ;;  %2080 = vmatpush1.bf16.msra.mxu1 %v2835_v50  ;;  %v2922_v49 = vld [vmem:[%s3266_s17 + $0x4e0] ss:$16 sps:$4 sm:$0xff]   ;;  %v2925_v50 = vld [vmem:[%s3266_s17 + $0x4e8] ss:$16 sps:$4 sm:$0xff]  }
  0xa5   : > { %1909 = vmatprep.subr.bf16.mxu0 %v2840_v51  ;;  %2081 = vmatprep.subr.bf16.mxu1 %v2843_v52  ;;  %v2930_v51 = vld [vmem:[%s3266_s17 + $0x504] ss:$16 sps:$4 sm:$0xff]   ;;  %v2933_v52 = vld [vmem:[%s3266_s17 + $0x50c] ss:$16 sps:$4 sm:$0xff]  }
  0xa8   : > { %1910 = vmatpush1.bf16.msra.mxu0 %v2838_v53  ;;  %2082 = vmatpush1.bf16.msra.mxu1 %v2841_v54  ;;  %v2928_v53 = vld [vmem:[%s3266_s17 + $0x500] ss:$16 sps:$4 sm:$0xff]   ;;  %v2931_v54 = vld [vmem:[%s3266_s17 + $0x508] ss:$16 sps:$4 sm:$0xff]  }
  0xa9   : > { %1911 = vmatprep.subr.bf16.mxu0 %v2846_v55  ;;  %2083 = vmatprep.subr.bf16.mxu1 %v2849_v56  ;;  %v2936_v55 = vld [vmem:[%s3266_s17 + $0x524] ss:$16 sps:$4 sm:$0xff]   ;;  %v2939_v56 = vld [vmem:[%s3266_s17 + $0x52c] ss:$16 sps:$4 sm:$0xff]  }
  0xac   : > { %1912 = vmatpush1.bf16.msra.mxu0 %v2844_v57  ;;  %2084 = vmatpush1.bf16.msra.mxu1 %v2847_v58  ;;  %v2934_v57 = vld [vmem:[%s3266_s17 + $0x520] ss:$16 sps:$4 sm:$0xff]   ;;  %v2937_v58 = vld [vmem:[%s3266_s17 + $0x528] ss:$16 sps:$4 sm:$0xff]  }
  0xad   : > { %1913 = vmatprep.subr.bf16.mxu0 %v2852_v59  ;;  %2085 = vmatprep.subr.bf16.mxu1 %v2855_v60  ;;  %v2942_v59 = vld [vmem:[%s3266_s17 + $0x544] ss:$16 sps:$4 sm:$0xff]   ;;  %v2945_v60 = vld [vmem:[%s3266_s17 + $0x54c] ss:$16 sps:$4 sm:$0xff]  }
  0xb0   : > { %1914 = vmatpush1.bf16.msra.mxu0 %v2850_v61  ;;  %2086 = vmatpush1.bf16.msra.mxu1 %v2853_v62  ;;  %v2940_v61 = vld [vmem:[%s3266_s17 + $0x540] ss:$16 sps:$4 sm:$0xff]   ;;  %v2943_v62 = vld [vmem:[%s3266_s17 + $0x548] ss:$16 sps:$4 sm:$0xff]  }
  0xb1   : > { %1915 = vmatprep.subr.bf16.mxu0 %v2858_v63  ;;  %2087 = vmatprep.subr.bf16.mxu1 %v2861_v0  ;;  %v2948_v63 = vld [vmem:[%s3266_s17 + $0x564] ss:$16 sps:$4 sm:$0xff]   ;;  %v2951_v0 = vld [vmem:[%s3266_s17 + $0x56c] ss:$16 sps:$4 sm:$0xff]  }
  0xb4   : > { %1916 = vmatpush1.bf16.msra.mxu0 %v2856_v1  ;;  %2088 = vmatpush1.bf16.msra.mxu1 %v2859_v2  ;;  %v2946_v1 = vld [vmem:[%s3266_s17 + $0x560] ss:$16 sps:$4 sm:$0xff]   ;;  %v2949_v2 = vld [vmem:[%s3266_s17 + $0x568] ss:$16 sps:$4 sm:$0xff]  }
  0xb5   : > { %1917 = vmatprep.subr.bf16.mxu0 %v2864_v3  ;;  %2089 = vmatprep.subr.bf16.mxu1 %v2867_v4  ;;  %v2954_v3 = vld [vmem:[%s3266_s17 + $0x584] ss:$16 sps:$4 sm:$0xff]   ;;  %v2957_v4 = vld [vmem:[%s3266_s17 + $0x58c] ss:$16 sps:$4 sm:$0xff]  }
  0xb8   : > { %1918 = vmatpush1.bf16.msra.mxu0 %v2862_v5  ;;  %2090 = vmatpush1.bf16.msra.mxu1 %v2865_v6  ;;  %v2952_v5 = vld [vmem:[%s3266_s17 + $0x580] ss:$16 sps:$4 sm:$0xff]   ;;  %v2955_v6 = vld [vmem:[%s3266_s17 + $0x588] ss:$16 sps:$4 sm:$0xff]  }
  0xb9   : > { %1919 = vmatprep.subr.bf16.mxu0 %v2870_v7  ;;  %2091 = vmatprep.subr.bf16.mxu1 %v2873_v8  ;;  %v2960_v7 = vld [vmem:[%s3266_s17 + $0x5a4] ss:$16 sps:$4 sm:$0xff]   ;;  %v2963_v8 = vld [vmem:[%s3266_s17 + $0x5ac] ss:$16 sps:$4 sm:$0xff]  }
  0xbc   : > { %1920 = vmatpush1.bf16.msra.mxu0 %v2868_v9  ;;  %2092 = vmatpush1.bf16.msra.mxu1 %v2871_v10  ;;  %v2958_v9 = vld [vmem:[%s3266_s17 + $0x5a0] ss:$16 sps:$4 sm:$0xff]   ;;  %v2961_v10 = vld [vmem:[%s3266_s17 + $0x5a8] ss:$16 sps:$4 sm:$0xff]  }
  0xbd   : > { %1921 = vmatprep.subr.bf16.mxu0 %v2876_v11  ;;  %2093 = vmatprep.subr.bf16.mxu1 %v2879_v12  ;;  %v2966_v11 = vld [vmem:[%s3266_s17 + $0x5c4] ss:$16 sps:$4 sm:$0xff]   ;;  %v2969_v12 = vld [vmem:[%s3266_s17 + $0x5cc] ss:$16 sps:$4 sm:$0xff]  }
  0xc0   : > { %1922 = vmatpush1.bf16.msra.mxu0 %v2874_v13  ;;  %2094 = vmatpush1.bf16.msra.mxu1 %v2877_v14  ;;  %v2964_v13 = vld [vmem:[%s3266_s17 + $0x5c0] ss:$16 sps:$4 sm:$0xff]   ;;  %v2967_v14 = vld [vmem:[%s3266_s17 + $0x5c8] ss:$16 sps:$4 sm:$0xff]  }
  0xc1   : > { %1934 = vmatprep.subr.bf16.mxu0 %v2882_v15  ;;  %2106 = vmatprep.subr.bf16.mxu1 %v2885_v16  ;;  %v2972_v15 = vld [vmem:[%s3266_s17 + $0x5e4] ss:$16 sps:$4 sm:$0xff]   ;;  %v2975_v16 = vld [vmem:[%s3266_s17 + $0x5ec] ss:$16 sps:$4 sm:$0xff]  }
  0xc3   : > { %1924 = vmatmul.mubr.bf16.vlgmr.msra.gmra.mrb[0].mxu0 %v2344_v17  ;;  %2096 = vmatmul.mubr.bf16.vlgmr.msra.gmra.mrb[0].mxu1 %v2344_v17  ;;  %v2970_v17 = vld [vmem:[%s3266_s17 + $0x5e0] ss:$16 sps:$4 sm:$0xff]  }
  0xc4   : > { %1935 = vmatpush1.bf16.msra.mxu0 %v2880_v18  ;;  %2107 = vmatpush1.bf16.msra.mxu1 %v2883_v19  ;;  %v2973_v18 = vld [vmem:[%s3266_s17 + $0x5e8] ss:$16 sps:$4 sm:$0xff]   ;;  %v2978_v19 = vld [vmem:[%s3266_s17 + $0x604] ss:$16 sps:$4 sm:$0xff]  }
  0xc5   : > { %1936 = vmatprep.subr.bf16.mxu0 %v2888_v20  ;;  %2108 = vmatprep.subr.bf16.mxu1 %v2891_v21  ;;  %v2981_v20 = vld [vmem:[%s3266_s17 + $0x60c] ss:$16 sps:$4 sm:$0xff]   ;;  %v2346_v21 = vcombine.low %v3419_v22, %v3422_v23  ;;  %v2982_v23 = vld [vmem:[%s3266_s17 + $0x620] ss:$16 sps:$4 sm:$0xff]  }
  0xc6   : > { %1966 = vmatprep.mubr.bf16.mxu0 %v2347_v24  ;;  %2138 = vmatprep.mubr.bf16.mxu1 %v2347_v24  ;;  %v3489_v24 = vld [vmem:[%s3264_s7 + $0x18] sm:$0xff] }
  0xc8   : > { %1937 = vmatpush1.bf16.msra.mxu0 %v2886_v25  ;;  %2109 = vmatpush1.bf16.msra.mxu1 %v2889_v26  ;;  %v3492_v25 = vld [vmem:[%s3264_s7 + $0x38] sm:$0xff]  ;;  %v2976_v26 = vld [vmem:[%s3266_s17 + $0x600] ss:$16 sps:$4 sm:$0xff]  }
  0xc9   : > { %1938 = vmatprep.subr.bf16.mxu0 %v2894_v27  ;;  %2110 = vmatprep.subr.bf16.mxu1 %v2897_v28  ;;  %v2979_v27 = vld [vmem:[%s3266_s17 + $0x608] ss:$16 sps:$4 sm:$0xff]   ;;  %v2984_v28 = vld [vmem:[%s3266_s17 + $0x624] ss:$16 sps:$4 sm:$0xff]   ;;  %v2349_v22 = vcombine.high %v3489_v24, %v3492_v25 }
  0xcc   : > { %1939 = vmatpush1.bf16.msra.mxu0 %v2892_v29  ;;  %2111 = vmatpush1.bf16.msra.mxu1 %v2895_v30  ;;  %v2987_v29 = vld [vmem:[%s3266_s17 + $0x62c] ss:$16 sps:$4 sm:$0xff]   ;;  %v2985_v30 = vld [vmem:[%s3266_s17 + $0x628] ss:$16 sps:$4 sm:$0xff]  }
  0xcd   : > { %1940 = vmatprep.subr.bf16.mxu0 %v2900_v31  ;;  %2112 = vmatprep.subr.bf16.mxu1 %v2903_v32  ;;  %v2990_v31 = vld [vmem:[%s3266_s17 + $0x644] ss:$16 sps:$4 sm:$0xff]   ;;  %v2993_v32 = vld [vmem:[%s3266_s17 + $0x64c] ss:$16 sps:$4 sm:$0xff]  }
  0xd0   : > { %1941 = vmatpush1.bf16.msra.mxu0 %v2898_v33  ;;  %2113 = vmatpush1.bf16.msra.mxu1 %v2901_v34  ;;  %v2988_v33 = vld [vmem:[%s3266_s17 + $0x640] ss:$16 sps:$4 sm:$0xff]   ;;  %v2991_v34 = vld [vmem:[%s3266_s17 + $0x648] ss:$16 sps:$4 sm:$0xff]  }
  0xd1   : > { %1942 = vmatprep.subr.bf16.mxu0 %v2906_v35  ;;  %2114 = vmatprep.subr.bf16.mxu1 %v2909_v36  ;;  %v2996_v35 = vld [vmem:[%s3266_s17 + $0x664] ss:$16 sps:$4 sm:$0xff]   ;;  %v2999_v36 = vld [vmem:[%s3266_s17 + $0x66c] ss:$16 sps:$4 sm:$0xff]  }
  0xd4   : > { %1943 = vmatpush1.bf16.msra.mxu0 %v2904_v37  ;;  %2115 = vmatpush1.bf16.msra.mxu1 %v2907_v38  ;;  %v2994_v37 = vld [vmem:[%s3266_s17 + $0x660] ss:$16 sps:$4 sm:$0xff]   ;;  %v2997_v38 = vld [vmem:[%s3266_s17 + $0x668] ss:$16 sps:$4 sm:$0xff]  }
  0xd5   : > { %1944 = vmatprep.subr.bf16.mxu0 %v2912_v39  ;;  %2116 = vmatprep.subr.bf16.mxu1 %v2915_v40  ;;  %v3002_v39 = vld [vmem:[%s3266_s17 + $0x684] ss:$16 sps:$4 sm:$0xff]   ;;  %v3005_v40 = vld [vmem:[%s3266_s17 + $0x68c] ss:$16 sps:$4 sm:$0xff]  }
  0xd8   : > { %1945 = vmatpush1.bf16.msra.mxu0 %v2910_v41  ;;  %2117 = vmatpush1.bf16.msra.mxu1 %v2913_v42  ;;  %v3000_v41 = vld [vmem:[%s3266_s17 + $0x680] ss:$16 sps:$4 sm:$0xff]   ;;  %v3003_v42 = vld [vmem:[%s3266_s17 + $0x688] ss:$16 sps:$4 sm:$0xff]  }
  0xd9   : > { %1946 = vmatprep.subr.bf16.mxu0 %v2918_v43  ;;  %2118 = vmatprep.subr.bf16.mxu1 %v2921_v44  ;;  %v3008_v43 = vld [vmem:[%s3266_s17 + $0x6a4] ss:$16 sps:$4 sm:$0xff]   ;;  %v3011_v44 = vld [vmem:[%s3266_s17 + $0x6ac] ss:$16 sps:$4 sm:$0xff]  }
  0xdc   : > { %1947 = vmatpush1.bf16.msra.mxu0 %v2916_v45  ;;  %2119 = vmatpush1.bf16.msra.mxu1 %v2919_v46  ;;  %v3006_v45 = vld [vmem:[%s3266_s17 + $0x6a0] ss:$16 sps:$4 sm:$0xff]   ;;  %v3009_v46 = vld [vmem:[%s3266_s17 + $0x6a8] ss:$16 sps:$4 sm:$0xff]  }
  0xdd   : > { %1948 = vmatprep.subr.bf16.mxu0 %v2924_v47  ;;  %2120 = vmatprep.subr.bf16.mxu1 %v2927_v48  ;;  %v3014_v47 = vld [vmem:[%s3266_s17 + $0x6c4] ss:$16 sps:$4 sm:$0xff]   ;;  %v3017_v48 = vld [vmem:[%s3266_s17 + $0x6cc] ss:$16 sps:$4 sm:$0xff]  }
  0xe0   : > { %1949 = vmatpush1.bf16.msra.mxu0 %v2922_v49  ;;  %2121 = vmatpush1.bf16.msra.mxu1 %v2925_v50  ;;  %v3012_v49 = vld [vmem:[%s3266_s17 + $0x6c0] ss:$16 sps:$4 sm:$0xff]   ;;  %v3015_v50 = vld [vmem:[%s3266_s17 + $0x6c8] ss:$16 sps:$4 sm:$0xff]  }
  0xe1   : > { %1950 = vmatprep.subr.bf16.mxu0 %v2930_v51  ;;  %2122 = vmatprep.subr.bf16.mxu1 %v2933_v52  ;;  %v3020_v51 = vld [vmem:[%s3266_s17 + $0x6e4] ss:$16 sps:$4 sm:$0xff]   ;;  %v3023_v52 = vld [vmem:[%s3266_s17 + $0x6ec] ss:$16 sps:$4 sm:$0xff]  }
  0xe4   : > { %1951 = vmatpush1.bf16.msra.mxu0 %v2928_v53  ;;  %2123 = vmatpush1.bf16.msra.mxu1 %v2931_v54  ;;  %v3018_v53 = vld [vmem:[%s3266_s17 + $0x6e0] ss:$16 sps:$4 sm:$0xff]   ;;  %v3021_v54 = vld [vmem:[%s3266_s17 + $0x6e8] ss:$16 sps:$4 sm:$0xff]  }
  0xe5   : > { %1952 = vmatprep.subr.bf16.mxu0 %v2936_v55  ;;  %2124 = vmatprep.subr.bf16.mxu1 %v2939_v56  ;;  %v3026_v55 = vld [vmem:[%s3266_s17 + $0x704] ss:$16 sps:$4 sm:$0xff]   ;;  %v3029_v56 = vld [vmem:[%s3266_s17 + $0x70c] ss:$16 sps:$4 sm:$0xff]  }
  0xe8   : > { %1953 = vmatpush1.bf16.msra.mxu0 %v2934_v57  ;;  %2125 = vmatpush1.bf16.msra.mxu1 %v2937_v58  ;;  %v3024_v57 = vld [vmem:[%s3266_s17 + $0x700] ss:$16 sps:$4 sm:$0xff]   ;;  %v3027_v58 = vld [vmem:[%s3266_s17 + $0x708] ss:$16 sps:$4 sm:$0xff]  }
  0xe9   : > { %1954 = vmatprep.subr.bf16.mxu0 %v2942_v59  ;;  %2126 = vmatprep.subr.bf16.mxu1 %v2945_v60  ;;  %v3032_v59 = vld [vmem:[%s3266_s17 + $0x724] ss:$16 sps:$4 sm:$0xff]   ;;  %v3035_v60 = vld [vmem:[%s3266_s17 + $0x72c] ss:$16 sps:$4 sm:$0xff]  }
  0xec   : > { %1955 = vmatpush1.bf16.msra.mxu0 %v2940_v61  ;;  %2127 = vmatpush1.bf16.msra.mxu1 %v2943_v62  ;;  %v3030_v61 = vld [vmem:[%s3266_s17 + $0x720] ss:$16 sps:$4 sm:$0xff]   ;;  %v3033_v62 = vld [vmem:[%s3266_s17 + $0x728] ss:$16 sps:$4 sm:$0xff]  }
  0xed   : > { %1956 = vmatprep.subr.bf16.mxu0 %v2948_v63  ;;  %2128 = vmatprep.subr.bf16.mxu1 %v2951_v0  ;;  %v3038_v63 = vld [vmem:[%s3266_s17 + $0x744] ss:$16 sps:$4 sm:$0xff]   ;;  %v3041_v0 = vld [vmem:[%s3266_s17 + $0x74c] ss:$16 sps:$4 sm:$0xff]  }
  0xf0   : > { %1957 = vmatpush1.bf16.msra.mxu0 %v2946_v1  ;;  %2129 = vmatpush1.bf16.msra.mxu1 %v2949_v2  ;;  %v3036_v1 = vld [vmem:[%s3266_s17 + $0x740] ss:$16 sps:$4 sm:$0xff]   ;;  %v3039_v2 = vld [vmem:[%s3266_s17 + $0x748] ss:$16 sps:$4 sm:$0xff]  }
  0xf1   : > { %1958 = vmatprep.subr.bf16.mxu0 %v2954_v3  ;;  %2130 = vmatprep.subr.bf16.mxu1 %v2957_v4  ;;  %v3044_v3 = vld [vmem:[%s3266_s17 + $0x764] ss:$16 sps:$4 sm:$0xff]   ;;  %v3047_v4 = vld [vmem:[%s3266_s17 + $0x76c] ss:$16 sps:$4 sm:$0xff]  }
  0xf4   : > { %1959 = vmatpush1.bf16.msra.mxu0 %v2952_v5  ;;  %2131 = vmatpush1.bf16.msra.mxu1 %v2955_v6  ;;  %v3042_v5 = vld [vmem:[%s3266_s17 + $0x760] ss:$16 sps:$4 sm:$0xff]   ;;  %v3045_v6 = vld [vmem:[%s3266_s17 + $0x768] ss:$16 sps:$4 sm:$0xff]  }
  0xf5   : > { %1960 = vmatprep.subr.bf16.mxu0 %v2960_v7  ;;  %2132 = vmatprep.subr.bf16.mxu1 %v2963_v8  ;;  %v3050_v7 = vld [vmem:[%s3266_s17 + $0x784] ss:$16 sps:$4 sm:$0xff]   ;;  %v3053_v8 = vld [vmem:[%s3266_s17 + $0x78c] ss:$16 sps:$4 sm:$0xff]  }
  0xf8   : > { %1961 = vmatpush1.bf16.msra.mxu0 %v2958_v9  ;;  %2133 = vmatpush1.bf16.msra.mxu1 %v2961_v10  ;;  %v3048_v9 = vld [vmem:[%s3266_s17 + $0x780] ss:$16 sps:$4 sm:$0xff]   ;;  %v3051_v10 = vld [vmem:[%s3266_s17 + $0x788] ss:$16 sps:$4 sm:$0xff]  }
  0xf9   : > { %1962 = vmatprep.subr.bf16.mxu0 %v2966_v11  ;;  %2134 = vmatprep.subr.bf16.mxu1 %v2969_v12  ;;  %v3056_v11 = vld [vmem:[%s3266_s17 + $0x7a4] ss:$16 sps:$4 sm:$0xff]   ;;  %v3059_v12 = vld [vmem:[%s3266_s17 + $0x7ac] ss:$16 sps:$4 sm:$0xff]  }
  0xfc   : > { %1963 = vmatpush1.bf16.msra.mxu0 %v2964_v13  ;;  %2135 = vmatpush1.bf16.msra.mxu1 %v2967_v14  ;;  %v3054_v13 = vld [vmem:[%s3266_s17 + $0x7a0] ss:$16 sps:$4 sm:$0xff]   ;;  %v3057_v14 = vld [vmem:[%s3266_s17 + $0x7a8] ss:$16 sps:$4 sm:$0xff]  }
  0xfd   : > { %1964 = vmatprep.subr.bf16.mxu0 %v2972_v15  ;;  %2136 = vmatprep.subr.bf16.mxu1 %v2975_v16  ;;  %v3062_v15 = vld [vmem:[%s3266_s17 + $0x7c4] ss:$16 sps:$4 sm:$0xff]   ;;  %v3065_v16 = vld [vmem:[%s3266_s17 + $0x7cc] ss:$16 sps:$4 sm:$0xff]  }
 0x100   : > { %1965 = vmatpush1.bf16.msra.mxu0 %v2970_v17  ;;  %2137 = vmatpush1.bf16.msra.mxu1 %v2973_v18  ;;  %v3060_v17 = vld [vmem:[%s3266_s17 + $0x7c0] ss:$16 sps:$4 sm:$0xff]   ;;  %v3063_v18 = vld [vmem:[%s3266_s17 + $0x7c8] ss:$16 sps:$4 sm:$0xff]  }
 0x101   : > { %1977 = vmatprep.subr.bf16.mxu0 %v2978_v19  ;;  %2149 = vmatprep.subr.bf16.mxu1 %v2981_v20  ;;  %v3068_v19 = vld [vmem:[%s3266_s17 + $0x7e4] ss:$16 sps:$4 sm:$0xff]   ;;  %v3071_v20 = vld [vmem:[%s3266_s17 + $0x7ec] ss:$16 sps:$4 sm:$0xff]  }
 0x103   : > { %1967 = vmatmul.mubr.bf16.vlgmr.msra.gmra.mrb[0].mxu0 %v2346_v21  ;;  %2139 = vmatmul.mubr.bf16.vlgmr.msra.gmra.mrb[0].mxu1 %v2346_v21  ;;  %v3066_v21 = vld [vmem:[%s3266_s17 + $0x7e0] ss:$16 sps:$4 sm:$0xff]  }
 0x104   : > { %1978 = vmatpush1.bf16.msra.mxu0 %v2976_v26  ;;  %2150 = vmatpush1.bf16.msra.mxu1 %v2979_v27  ;;  %v3069_v26 = vld [vmem:[%s3266_s17 + $0x7e8] ss:$16 sps:$4 sm:$0xff]   ;;  %v2348_v27 = vcombine.low %v3489_v24, %v3492_v25 }
 0x105   : > { %1979 = vmatprep.subr.bf16.mxu0 %v2984_v28  ;;  %2151 = vmatprep.subr.bf16.mxu1 %v2987_v29 }
 0x106   : > { %2009 = vmatprep.mubr.bf16.mxu0 %v2349_v22  ;;  %2181 = vmatprep.mubr.bf16.mxu1 %v2349_v22 }
 0x108   : > { %1980 = vmatpush1.bf16.msra.mxu0 %v2982_v23  ;;  %2152 = vmatpush1.bf16.msra.mxu1 %v2985_v30 }
 0x109   : > { %1981 = vmatprep.subr.bf16.mxu0 %v2990_v31  ;;  %2153 = vmatprep.subr.bf16.mxu1 %v2993_v32 }
 0x10c   : > { %1982 = vmatpush1.bf16.msra.mxu0 %v2988_v33  ;;  %2154 = vmatpush1.bf16.msra.mxu1 %v2991_v34 }
 0x10d   : > { %1983 = vmatprep.subr.bf16.mxu0 %v2996_v35  ;;  %2155 = vmatprep.subr.bf16.mxu1 %v2999_v36 }
 0x110   : > { %1984 = vmatpush1.bf16.msra.mxu0 %v2994_v37  ;;  %2156 = vmatpush1.bf16.msra.mxu1 %v2997_v38 }
 0x111   : > { %1985 = vmatprep.subr.bf16.mxu0 %v3002_v39  ;;  %2157 = vmatprep.subr.bf16.mxu1 %v3005_v40 }
 0x114   : > { %1986 = vmatpush1.bf16.msra.mxu0 %v3000_v41  ;;  %2158 = vmatpush1.bf16.msra.mxu1 %v3003_v42 }
 0x115   : > { %1987 = vmatprep.subr.bf16.mxu0 %v3008_v43  ;;  %2159 = vmatprep.subr.bf16.mxu1 %v3011_v44 }
 0x118   : > { %1988 = vmatpush1.bf16.msra.mxu0 %v3006_v45  ;;  %2160 = vmatpush1.bf16.msra.mxu1 %v3009_v46 }
 0x119   : > { %1989 = vmatprep.subr.bf16.mxu0 %v3014_v47  ;;  %2161 = vmatprep.subr.bf16.mxu1 %v3017_v48 }
 0x11c   : > { %1990 = vmatpush1.bf16.msra.mxu0 %v3012_v49  ;;  %2162 = vmatpush1.bf16.msra.mxu1 %v3015_v50 }
 0x11d   : > { %1991 = vmatprep.subr.bf16.mxu0 %v3020_v51  ;;  %2163 = vmatprep.subr.bf16.mxu1 %v3023_v52 }
 0x120   : > { %1992 = vmatpush1.bf16.msra.mxu0 %v3018_v53  ;;  %2164 = vmatpush1.bf16.msra.mxu1 %v3021_v54 }
 0x121   : > { %1993 = vmatprep.subr.bf16.mxu0 %v3026_v55  ;;  %2165 = vmatprep.subr.bf16.mxu1 %v3029_v56 }
 0x124   : > { %1994 = vmatpush1.bf16.msra.mxu0 %v3024_v57  ;;  %2166 = vmatpush1.bf16.msra.mxu1 %v3027_v58 }
 0x125   : > { %1995 = vmatprep.subr.bf16.mxu0 %v3032_v59  ;;  %2167 = vmatprep.subr.bf16.mxu1 %v3035_v60 }
 0x128   : > { %1996 = vmatpush1.bf16.msra.mxu0 %v3030_v61  ;;  %2168 = vmatpush1.bf16.msra.mxu1 %v3033_v62 }
 0x129   : > { %1997 = vmatprep.subr.bf16.mxu0 %v3038_v63  ;;  %2169 = vmatprep.subr.bf16.mxu1 %v3041_v0 }
 0x12c   : > { %1998 = vmatpush1.bf16.msra.mxu0 %v3036_v1  ;;  %2170 = vmatpush1.bf16.msra.mxu1 %v3039_v2 }
 0x12d   : > { %1999 = vmatprep.subr.bf16.mxu0 %v3044_v3  ;;  %2171 = vmatprep.subr.bf16.mxu1 %v3047_v4 }
 0x130   : > { %2000 = vmatpush1.bf16.msra.mxu0 %v3042_v5  ;;  %2172 = vmatpush1.bf16.msra.mxu1 %v3045_v6 }
 0x131   : > { %2001 = vmatprep.subr.bf16.mxu0 %v3050_v7  ;;  %2173 = vmatprep.subr.bf16.mxu1 %v3053_v8 }
 0x134   : > { %2002 = vmatpush1.bf16.msra.mxu0 %v3048_v9  ;;  %2174 = vmatpush1.bf16.msra.mxu1 %v3051_v10 }
 0x135   : > { %2003 = vmatprep.subr.bf16.mxu0 %v3056_v11  ;;  %2175 = vmatprep.subr.bf16.mxu1 %v3059_v12 }
 0x138   : > { %2004 = vmatpush1.bf16.msra.mxu0 %v3054_v13  ;;  %2176 = vmatpush1.bf16.msra.mxu1 %v3057_v14 }
 0x139   : > { %2005 = vmatprep.subr.bf16.mxu0 %v3062_v15  ;;  %2177 = vmatprep.subr.bf16.mxu1 %v3065_v16 }
 0x13c   : > { %2006 = vmatpush1.bf16.msra.mxu0 %v3060_v17  ;;  %2178 = vmatpush1.bf16.msra.mxu1 %v3063_v18 }
 0x13d   : > { %2007 = vmatprep.subr.bf16.mxu0 %v3068_v19  ;;  %2179 = vmatprep.subr.bf16.mxu1 %v3071_v20 }
 0x140   : > { %2008 = vmatpush1.bf16.msra.mxu0 %v3066_v21  ;;  %2180 = vmatpush1.bf16.msra.mxu1 %v3069_v26 }
 0x143   : > { %2010 = vmatmul.mubr.bf16.vlgmr.msra.gmra.mrb[0].mxu0 %v2348_v27  ;;  %2182 = vmatmul.mubr.bf16.vlgmr.msra.gmra.mrb[0].mxu1 %v2348_v27 }
 0x216   : > { %v2011_v28 = vpop.f32.mrb[0].mxu0  ;;  %v2183_v29 = vpop.f32.mrb[0].mxu1 }
 0x217   : > { %2219 = vst [vmem:[%s242_s9] sm:$0xff] %v2011_v28  ;;  %2221 = vst [vmem:[%s242_s9 + $0x10] sm:$0xff] %v2183_v29  ;;  %v2013_v22 = vpop.f32.mrb[1].mxu0  ;;  %v2185_v23 = vpop.f32.mrb[1].mxu1 }
 0x218   : > { %2220 = vst [vmem:[%s242_s9 + $0x8] sm:$0xff] %v2013_v22  ;;  %2222 = vst [vmem:[%s242_s9 + $0x18] sm:$0xff] %v2185_v23  ;;  %v2015_v24 = vpop.f32.mrb[2].mxu0  ;;  %v2187_v25 = vpop.f32.mrb[2].mxu1 }
 0x219   : > { %2223 = vst [vmem:[%s242_s9 + $0x20] sm:$0xff] %v2015_v24  ;;  %2225 = vst [vmem:[%s242_s9 + $0x30] sm:$0xff] %v2187_v25  ;;  %v2017_v30 = vpop.f32.mrb[3].mxu0  ;;  %v2189_v31 = vpop.f32.mrb[3].mxu1 }
 0x21a   : > { %2224 = vst [vmem:[%s242_s9 + $0x28] sm:$0xff] %v2017_v30  ;;  %2226 = vst [vmem:[%s242_s9 + $0x38] sm:$0xff] %v2189_v31 }
 0x21b PF: > { %s15_s14 = sadd.s32 1, %s3150_s14   ;;  %s3587_s9 = smov %s3134_s10 }
 0x21c   : > { %p12_p7 = scmp.ge.s32.totalorder %s15_s14, 4   ;;  %s3588_s10 = smov %s3138_s11 }
 0x21d   : > { %s3589_s11 = smov %s3218_s21  ;;  %s3590_s12 = smov %s3146_s13 }
 0x21e   : > { %s3591_s13 = smov %s3593_s16  ;;  %14 = sbr.rel (!%p12_p7) target bundleno = 4 (0x4), region = 107 }
 0x225   :  { %2251 = vsyncpa [#allocation5], 1 }
 0x226   :  { %2253 = vsyncpa [#allocation5 + $0x1], 1 }

</bundles_post_ra>
